<compile_context>
chip_gen: v7x
topology: tpu7x:2x2x1
jax: 0.10.0
libtpu: 0.0.40
codegen_flags: <defaults>
</compile_context>

<pallas_src>
import functools

import jax
import jax.numpy as jnp
from jax import lax
from jax.experimental import pallas as pl
from jax.experimental.pallas import tpu as pltpu


def _self_attn_kernel(xq_ref, k_ref, v_ref, kb_ref, wqt_ref, gamma_ref,
                      o_ref, a_sc, m_sc, l_sc, acc_sc,
                      *, compute_dtype, exp_dtype):
    """Grid = (batch, query-tile, key-tile); online softmax over key tiles."""
    kv = pl.program_id(2)
    cdt = compute_dtype

    @pl.when(kv == 0)
    def _init():
        # Per-(batch, q-tile) init: query projection a = Wq^T Xq -> (C/8, TQ)
        # and the online-softmax running state.  The query bias bq only enters
        # terms constant along the softmax (key) axis plus the per-key bias in
        # kb_ref, so it is omitted exactly (cancels under softmax).
        a = jnp.dot(wqt_ref[...], xq_ref[0].astype(cdt),
                    preferred_element_type=jnp.float32)
        a_sc[...] = a.astype(cdt)
        m_sc[...] = jnp.full_like(m_sc, -jnp.inf)
        l_sc[...] = jnp.zeros_like(l_sc)
        acc_sc[...] = jnp.zeros_like(acc_sc)

    k = k_ref[0]                                     # (C/8, TKV) compute dtype
    v = v_ref[0]                                     # (C,   TKV) compute dtype

    # Scores in transposed orientation: energy_t[j, i] = q_i . k_j
    # (sublane-contracted dot_general maps natively to the MXU; no transposes).
    energy_t = lax.dot_general(k, a_sc[...],
                               dimension_numbers=(((0,), (0,)), ((), ())),
                               preferred_element_type=jnp.float32)   # (TKV, TQ)
    energy_t = energy_t + kb_ref[0]                  # + bq . k_j    (TKV, 1)

    # Online softmax over the key (sublane) axis; state is per query column.
    m_prev = m_sc[...]                                               # (1, TQ)
    m_new = jnp.maximum(m_prev, jnp.max(energy_t, axis=0, keepdims=True))
    alpha = jnp.exp(m_prev - m_new)                                  # (1, TQ) f32
    # exp in bf16 only on chips with a bf16 EUP (v6e/v7x); inputs <= 0 post-max.
    p = jnp.exp((energy_t - m_new).astype(exp_dtype))                # (TKV, TQ)
    l_sc[...] = alpha * l_sc[...] + jnp.sum(p.astype(jnp.float32),
                                            axis=0, keepdims=True)
    m_sc[...] = m_new

    pv = jnp.dot(v, p.astype(cdt),
                 preferred_element_type=jnp.float32)                 # (C, TQ)
    acc_sc[...] = alpha * acc_sc[...] + pv

    @pl.when(kv == pl.num_programs(2) - 1)
    def _finalize():
        inv_l = pl.reciprocal(l_sc[...],
                              approx=(cdt != jnp.dtype(jnp.float32)))
        out = acc_sc[...] * inv_l                                    # (C, TQ)
        gamma = gamma_ref[0, 0]
        o_ref[0] = (gamma * out + xq_ref[0]).astype(o_ref.dtype)


def _largest_divisor_tile(n, candidates):
    for t in candidates:
        if t <= n and n % t == 0:
            return t
    return n


def _default_exp_dtype(compute_dtype):
    if jnp.dtype(compute_dtype) == jnp.dtype(jnp.float32):
        return jnp.float32
    try:
        kind = jax.devices()[0].device_kind.lower()
    except Exception:
        return jnp.float32
    # bf16 EUP exists on v6e / v7x; v5e (and older) would emulate bf16 exp.
    if ("v6" in kind) or ("v7" in kind) or ("7x" in kind):
        return jnp.bfloat16
    return jnp.float32


def self_attn_forward(x_nchw, wq, wk, wv, bq, bk, bv, gamma, *,
                      compute_dtype=jnp.bfloat16, q_tile=None, kv_tile=None,
                      exp_dtype=None, vmem_limit_bytes=None):
    """x_nchw: (B, C, W, H). wq/wk: (C, C//8), wv: (C, C), biases 1-D.

    Returns (B, C, W, H) = gamma * attention(x) + x, matching the PyTorch module.
    """
    B, C, W, H = x_nchw.shape
    N = W * H
    C8 = wq.shape[1]
    del bk  # key bias contributes only row-constant terms -> cancels in softmax

    f32 = jnp.float32
    # NCHW -> (B, C, N) is a free reshape (n = w*H + h, matching torch .view).
    x_cn = x_nchw.reshape(B, C, N)
    x_f32 = x_cn.astype(f32)

    # Hoisted per-batch work (was re-done per query tile inside the kernel):
    #   K = Wk^T X                -> (B, C/8, N)
    #   kb[j] = bq . k_j          -> (B, N, 1)   (only non-cancelling bias term)
    #   V = Wv^T X + bv           -> (B, C,  N)
    k_proj = jnp.einsum("cd,bcn->bdn", wk.astype(f32), x_f32)
    kb = jnp.einsum("d,bdn->bn", bq.astype(f32), k_proj).reshape(B, N, 1)
    v_proj = (jnp.einsum("cd,bcn->bdn", wv.astype(f32), x_f32)
              + bv.astype(f32)[None, :, None])

    k_in = k_proj.astype(compute_dtype)       # pre-cast: halves K DMA / VMEM
    v_in = v_proj.astype(compute_dtype)       # pre-cast: halves V DMA / VMEM
    wqt = wq.astype(f32).T.astype(compute_dtype)     # (C/8, C)
    gamma2 = jnp.asarray(gamma, f32).reshape(1, 1)

    # Tile selection (lane-width multiples; bounded so VMEM stays small even
    # for large feature maps on v7x's 64 MiB budget).
    if q_tile is not None:
        tq = int(q_tile)
    elif N <= 512:
        tq = N
    else:
        tq = _largest_divisor_tile(N, (256, 128))
    if kv_tile is not None:
        tkv = int(kv_tile)
    elif N <= 1024:
        tkv = N
    else:
        tkv = _largest_divisor_tile(N, (1024, 512, 256, 128))
    assert N % tq == 0 and N % tkv == 0, (N, tq, tkv)
    nq, nkv = N // tq, N // tkv

    if exp_dtype is None:
        exp_dtype = _default_exp_dtype(compute_dtype)

    cdt_b = jnp.dtype(compute_dtype).itemsize
    out_b = jnp.dtype(x_nchw.dtype).itemsize

    # VMEM budget derived from the actual tile arithmetic (double-buffered
    # inputs/outputs + scratch + f32 score temporaries), with headroom.
    vmem_est = (2 * C * tq * 4                 # xq tile (f32)
                + 2 * C8 * tkv * cdt_b         # K tile
                + 2 * C * tkv * cdt_b          # V tile
                + 2 * tkv * 4                  # per-key bias tile
                + 2 * C8 * C * cdt_b           # Wq^T
                + 2 * C * tq * out_b           # output tile
                + C8 * tq * cdt_b              # a scratch
                + 2 * tq * 4                   # m / l scratch
                + C * tq * 4                   # acc scratch
                + 3 * tkv * tq * 4)            # energy / p temporaries
    if vmem_limit_bytes is None:
        vmem_limit_bytes = min(max(2 * vmem_est + (4 << 20), 32 << 20), 64 << 20)

    cost = pl.CostEstimate(
        flops=int(2 * B * (N * N * (C8 + C) + C8 * C * N)),
        transcendentals=int(B * N * N),
        bytes_accessed=int(B * ((4 + out_b) * C * N
                                + nq * cdt_b * (C8 + C) * N
                                + nq * 4 * N)
                           + cdt_b * C8 * C),
    )

    kernel = functools.partial(_self_attn_kernel,
                               compute_dtype=jnp.dtype(compute_dtype),
                               exp_dtype=jnp.dtype(exp_dtype))

    out_cn = pl.pallas_call(
        kernel,
        out_shape=jax.ShapeDtypeStruct((B, C, N), x_nchw.dtype),
        grid_spec=pltpu.PrefetchScalarGridSpec(
            num_scalar_prefetch=0,
            grid=(B, nq, nkv),
            in_specs=[
                pl.BlockSpec((1, C, tq), lambda b, q, k: (b, 0, q)),    # x (f32)
                pl.BlockSpec((1, C8, tkv), lambda b, q, k: (b, 0, k)),  # K
                pl.BlockSpec((1, C, tkv), lambda b, q, k: (b, 0, k)),   # V
                pl.BlockSpec((1, tkv, 1), lambda b, q, k: (b, k, 0)),   # kb
                pl.BlockSpec((C8, C), lambda b, q, k: (0, 0)),          # Wq^T
                pl.BlockSpec(memory_space=pltpu.MemorySpace.SMEM),      # gamma
            ],
            out_specs=pl.BlockSpec((1, C, tq), lambda b, q, k: (b, 0, q)),
            scratch_shapes=[
                pltpu.VMEM((C8, tq), jnp.dtype(compute_dtype)),  # a = Wq^T Xq
                pltpu.VMEM((1, tq), jnp.float32),                # running max
                pltpu.VMEM((1, tq), jnp.float32),                # running sum
                pltpu.VMEM((C, tq), jnp.float32),                # PV accumulator
            ]),
        compiler_params=pltpu.CompilerParams(
            dimension_semantics=("parallel", "parallel", "arbitrary"),
            vmem_limit_bytes=vmem_limit_bytes),
        cost_estimate=cost,
    )(x_cn, k_in, v_in, kb, wqt, gamma2)

    # (B, C, N) -> NCHW is again a free reshape (no transpose).
    return out_cn.reshape(B, C, W, H)


def self_attn_reference(x_nchw, wq, wk, wv, bq, bk, bv, gamma):
    """Pure-JAX reference mirroring the PyTorch forward (with Q/K biases)."""
    B, C, W, H = x_nchw.shape
    N = W * H
    x_flat = x_nchw.reshape(B, C, N)                      # (B, C, N)
    xt = jnp.transpose(x_flat, (0, 2, 1))                 # (B, N, C)
    q = jnp.einsum("bnc,cd->bnd", xt, wq) + bq            # proj_query
    k = jnp.einsum("bnc,cd->bnd", xt, wk) + bk            # proj_key
    v = jnp.einsum("bnc,cd->bnd", xt, wv) + bv            # proj_value
    energy = jnp.einsum("bid,bjd->bij", q, k)             # (B, N, N)
    attn = jax.nn.softmax(energy, axis=-1)
    out_seq = jnp.einsum("bij,bjc->bic", attn, v)         # (B, N, C)
    out = jnp.transpose(out_seq, (0, 2, 1)).reshape(B, C, W, H)
    return gamma * out + x_nchw


if __name__ == "__main__":
    B, C, W, H = 2, 32, 16, 16          # in_dim = 32 -> C//8 = 4, N = 256
    C8 = C // 8

    key = jax.random.PRNGKey(0)
    kx, kwq, kwk, kwv, kbq, kbk, kbv = jax.random.split(key, 7)

    x = jax.random.normal(kx, (B, C, W, H), dtype=jnp.float32)

    scale = 1.0 / jnp.sqrt(jnp.float32(C))
    wq = jax.random.uniform(kwq, (C, C8), jnp.float32, -scale, scale)
    wk = jax.random.uniform(kwk, (C, C8), jnp.float32, -scale, scale)
    wv = jax.random.uniform(kwv, (C, C), jnp.float32, -scale, scale)
    bq = jax.random.uniform(kbq, (C8,), jnp.float32, -scale, scale)
    bk = jax.random.uniform(kbk, (C8,), jnp.float32, -scale, scale)
    bv = jax.random.uniform(kbv, (C,), jnp.float32, -scale, scale)

    gamma = jnp.float32(0.5)    # nonzero so the attention path is exercised
    ref = self_attn_reference(x, wq, wk, wv, bq, bk, bv, gamma)

    # f32 compute, single kv step: validates projections / bias handling.
    out_f32 = jax.block_until_ready(
        self_attn_forward(x, wq, wk, wv, bq, bk, bv, gamma,
                          compute_dtype=jnp.float32))
    assert jnp.allclose(out_f32, ref, atol=5e-4, rtol=5e-4), "f32 path mismatch"

    # f32 compute with forced query/key tiling: validates the online softmax.
    out_f32_t = jax.block_until_ready(
        self_attn_forward(x, wq, wk, wv, bq, bk, bv, gamma,
                          compute_dtype=jnp.float32, q_tile=128, kv_tile=128))
    assert jnp.allclose(out_f32_t, ref, atol=5e-4, rtol=5e-4), "tiled path mismatch"

    # Default bf16 matmul path (f32 accumulation; bf16 exp only on v6e/v7x).
    out_bf16 = jax.block_until_ready(
        self_attn_forward(x, wq, wk, wv, bq, bk, bv, gamma))
    assert jnp.allclose(out_bf16, ref, atol=5e-2, rtol=5e-2), "bf16 path mismatch"

    # gamma = 0 (the module's init value): output must equal the input.
    out_g0 = jax.block_until_ready(
        self_attn_forward(x, wq, wk, wv, bq, bk, bv, jnp.float32(0.0)))
    assert jnp.allclose(out_g0, x, atol=1e-6, rtol=1e-6), "gamma=0 residual mismatch"

    print("KERNEL_OK")
</pallas_src>

<mosaic_0001>
module attributes {stable_mosaic.version = 11 : i64} {
  func.func @_self_attn_kernel(%arg0: i32, %arg1: i32, %arg2: i32, %arg3: memref<1x32x256xf32, #tpu.memory_space<vmem>>, %arg4: memref<1x4x256xf32, #tpu.memory_space<vmem>>, %arg5: memref<1x32x256xf32, #tpu.memory_space<vmem>>, %arg6: memref<1x256x1xf32, #tpu.memory_space<vmem>>, %arg7: memref<4x32xf32, #tpu.memory_space<vmem>>, %arg8: memref<1x1xf32, #tpu.memory_space<smem>>, %arg9: memref<1x32x256xf32, #tpu.memory_space<vmem>>, %arg10: memref<4x256xf32, #tpu.memory_space<vmem>>, %arg11: memref<1x256xf32, #tpu.memory_space<vmem>>, %arg12: memref<1x256xf32, #tpu.memory_space<vmem>>, %arg13: memref<32x256xf32, #tpu.memory_space<vmem>>) attributes {dimension_semantics = [#tpu.dimension_semantics<parallel>, #tpu.dimension_semantics<parallel>, #tpu.dimension_semantics<arbitrary>], iteration_bounds = array<i64: 2, 1, 1>, scalar_prefetch = 0 : i64, scratch_operands = 4 : i64, tpu.core_type = #tpu.core_type<tc>, window_params = [{transform_indices = @transform_0, window_bounds = array<i64: 1, 32, 256>}, {transform_indices = @transform_1, window_bounds = array<i64: 1, 4, 256>}, {transform_indices = @transform_2, window_bounds = array<i64: 1, 32, 256>}, {transform_indices = @transform_3, window_bounds = array<i64: 1, 256, 1>}, {pipeline_mode = #tpu.pipeline_mode<synchronous>, transform_indices = @transform_4, window_bounds = array<i64: 4, 32>}, {transform_indices = @transform_5, window_bounds = array<i64: 1, 1>}, {transform_indices = @transform_6, window_bounds = array<i64: 1, 32, 256>}]} {
    %c0_i32 = arith.constant 0 : i32
    %0 = arith.cmpi eq, %arg2, %c0_i32 : i32
    %1 = arith.extui %0 : i1 to i32
    %c0_i32_0 = arith.constant 0 : i32
    %2 = arith.cmpi ne, %1, %c0_i32_0 : i32
    scf.if %2 {
      %c0_28 = arith.constant 0 : index
      %c0_29 = arith.constant 0 : index
      %38 = vector.load %arg7[%c0_28, %c0_29] : memref<4x32xf32, #tpu.memory_space<vmem>>, vector<4x32xf32>
      %c0_30 = arith.constant 0 : index
      %c0_31 = arith.constant 0 : index
      %c0_32 = arith.constant 0 : index
      %39 = vector.load %arg3[%c0_30, %c0_31, %c0_32] : memref<1x32x256xf32, #tpu.memory_space<vmem>>, vector<1x32x256xf32>
      %40 = vector.shape_cast %39 : vector<1x32x256xf32> to vector<32x256xf32>
      %cst_33 = arith.constant dense<0.000000e+00> : vector<4x256xf32>
      %41 = tpu.matmul %38, %40, %cst_33 {dimension_numbers = #tpu.dot_dimension_numbers<[1], [0], [0], [1], [0, 0, 1, 1], [], []>} : vector<4x32xf32>, vector<32x256xf32>, vector<4x256xf32> -> vector<4x256xf32>
      %c0_34 = arith.constant 0 : index
      %c0_35 = arith.constant 0 : index
      %42 = vector.load %arg10[%c0_34, %c0_35] : memref<4x256xf32, #tpu.memory_space<vmem>>, vector<4x256xf32>
      tpu.vector_store %arg10[%c0_34, %c0_35], %41 {strides = array<i32>} : memref<4x256xf32, #tpu.memory_space<vmem>>, vector<4x256xf32>,
      %cst_36 = arith.constant 0xFF800000 : f32
      %43 = vector.broadcast %cst_36 : f32 to vector<1x256xf32>
      %c0_37 = arith.constant 0 : index
      %c0_38 = arith.constant 0 : index
      %44 = vector.load %arg11[%c0_37, %c0_38] : memref<1x256xf32, #tpu.memory_space<vmem>>, vector<1x256xf32>
      tpu.vector_store %arg11[%c0_37, %c0_38], %43 {strides = array<i32>} : memref<1x256xf32, #tpu.memory_space<vmem>>, vector<1x256xf32>,
      %cst_39 = arith.constant 0.000000e+00 : f32
      %45 = vector.broadcast %cst_39 : f32 to vector<1x256xf32>
      %c0_40 = arith.constant 0 : index
      %c0_41 = arith.constant 0 : index
      %46 = vector.load %arg12[%c0_40, %c0_41] : memref<1x256xf32, #tpu.memory_space<vmem>>, vector<1x256xf32>
      tpu.vector_store %arg12[%c0_40, %c0_41], %45 {strides = array<i32>} : memref<1x256xf32, #tpu.memory_space<vmem>>, vector<1x256xf32>,
      %cst_42 = arith.constant 0.000000e+00 : f32
      %47 = vector.broadcast %cst_42 : f32 to vector<32x256xf32>
      %c0_43 = arith.constant 0 : index
      %c0_44 = arith.constant 0 : index
      %48 = vector.load %arg13[%c0_43, %c0_44] : memref<32x256xf32, #tpu.memory_space<vmem>>, vector<32x256xf32>
      tpu.vector_store %arg13[%c0_43, %c0_44], %47 {strides = array<i32>} : memref<32x256xf32, #tpu.memory_space<vmem>>, vector<32x256xf32>,
    } else {
    }
    %c0 = arith.constant 0 : index
    %c0_1 = arith.constant 0 : index
    %c0_2 = arith.constant 0 : index
    %3 = vector.load %arg4[%c0, %c0_1, %c0_2] : memref<1x4x256xf32, #tpu.memory_space<vmem>>, vector<1x4x256xf32>
    %4 = vector.shape_cast %3 : vector<1x4x256xf32> to vector<4x256xf32>
    %c0_3 = arith.constant 0 : index
    %c0_4 = arith.constant 0 : index
    %c0_5 = arith.constant 0 : index
    %5 = vector.load %arg5[%c0_3, %c0_4, %c0_5] : memref<1x32x256xf32, #tpu.memory_space<vmem>>, vector<1x32x256xf32>
    %6 = vector.shape_cast %5 : vector<1x32x256xf32> to vector<32x256xf32>
    %c0_6 = arith.constant 0 : index
    %c0_7 = arith.constant 0 : index
    %7 = vector.load %arg10[%c0_6, %c0_7] : memref<4x256xf32, #tpu.memory_space<vmem>>, vector<4x256xf32>
    %cst = arith.constant dense<0.000000e+00> : vector<256x256xf32>
    %8 = tpu.matmul %4, %7, %cst {dimension_numbers = #tpu.dot_dimension_numbers<[0], [0], [1], [1], [0, 1, 1, 1], [], []>} : vector<4x256xf32>, vector<4x256xf32>, vector<256x256xf32> -> vector<256x256xf32>
    %c0_8 = arith.constant 0 : index
    %c0_9 = arith.constant 0 : index
    %c0_10 = arith.constant 0 : index
    %9 = vector.load %arg6[%c0_8, %c0_9, %c0_10] : memref<1x256x1xf32, #tpu.memory_space<vmem>>, vector<1x256x1xf32>
    %10 = vector.shape_cast %9 : vector<1x256x1xf32> to vector<256x1xf32>
    %11 = vector.broadcast %10 : vector<256x1xf32> to vector<256x256xf32>
    %12 = arith.addf %8, %11 : vector<256x256xf32>
    %c0_11 = arith.constant 0 : index
    %c0_12 = arith.constant 0 : index
    %13 = vector.load %arg11[%c0_11, %c0_12] : memref<1x256xf32, #tpu.memory_space<vmem>>, vector<1x256xf32>
    %cst_13 = arith.constant dense<0xFF800000> : vector<256xf32>
    %14 = vector.multi_reduction <maximumf>, %12, %cst_13 [0] : vector<256x256xf32> to vector<256xf32>
    %15 = vector.shape_cast %14 : vector<256xf32> to vector<1x256xf32>
    %16 = arith.maximumf %13, %15 : vector<1x256xf32>
    %17 = arith.subf %13, %16 : vector<1x256xf32>
    %18 = math.exp %17 : vector<1x256xf32>
    %19 = vector.broadcast %16 : vector<1x256xf32> to vector<256x256xf32>
    %20 = arith.subf %12, %19 : vector<256x256xf32>
    %21 = math.exp %20 : vector<256x256xf32>
    %c0_14 = arith.constant 0 : index
    %c0_15 = arith.constant 0 : index
    %22 = vector.load %arg12[%c0_14, %c0_15] : memref<1x256xf32, #tpu.memory_space<vmem>>, vector<1x256xf32>
    %23 = arith.mulf %18, %22 : vector<1x256xf32>
    %cst_16 = arith.constant dense<0.000000e+00> : vector<256xf32>
    %24 = vector.multi_reduction <add>, %21, %cst_16 [0] : vector<256x256xf32> to vector<256xf32>
    %25 = vector.shape_cast %24 : vector<256xf32> to vector<1x256xf32>
    %26 = arith.addf %23, %25 : vector<1x256xf32>
    %c0_17 = arith.constant 0 : index
    %c0_18 = arith.constant 0 : index
    %27 = vector.load %arg12[%c0_17, %c0_18] : memref<1x256xf32, #tpu.memory_space<vmem>>, vector<1x256xf32>
    tpu.vector_store %arg12[%c0_17, %c0_18], %26 {strides = array<i32>} : memref<1x256xf32, #tpu.memory_space<vmem>>, vector<1x256xf32>,
    %c0_19 = arith.constant 0 : index
    %c0_20 = arith.constant 0 : index
    %28 = vector.load %arg11[%c0_19, %c0_20] : memref<1x256xf32, #tpu.memory_space<vmem>>, vector<1x256xf32>
    tpu.vector_store %arg11[%c0_19, %c0_20], %16 {strides = array<i32>} : memref<1x256xf32, #tpu.memory_space<vmem>>, vector<1x256xf32>,
    %cst_21 = arith.constant dense<0.000000e+00> : vector<32x256xf32>
    %29 = tpu.matmul %6, %21, %cst_21 {dimension_numbers = #tpu.dot_dimension_numbers<[1], [0], [0], [1], [0, 0, 1, 1], [], []>} : vector<32x256xf32>, vector<256x256xf32>, vector<32x256xf32> -> vector<32x256xf32>
    %c0_22 = arith.constant 0 : index
    %c0_23 = arith.constant 0 : index
    %30 = vector.load %arg13[%c0_22, %c0_23] : memref<32x256xf32, #tpu.memory_space<vmem>>, vector<32x256xf32>
    %31 = vector.broadcast %18 : vector<1x256xf32> to vector<32x256xf32>
    %32 = arith.mulf %31, %30 : vector<32x256xf32>
    %33 = arith.addf %32, %29 : vector<32x256xf32>
    %c0_24 = arith.constant 0 : index
    %c0_25 = arith.constant 0 : index
    %34 = vector.load %arg13[%c0_24, %c0_25] : memref<32x256xf32, #tpu.memory_space<vmem>>, vector<32x256xf32>
    tpu.vector_store %arg13[%c0_24, %c0_25], %33 {strides = array<i32>} : memref<32x256xf32, #tpu.memory_space<vmem>>, vector<32x256xf32>,
    %c0_i32_26 = arith.constant 0 : i32
    %35 = arith.cmpi eq, %arg2, %c0_i32_26 : i32
    %36 = arith.extui %35 : i1 to i32
    %c0_i32_27 = arith.constant 0 : i32
    %37 = arith.cmpi ne, %36, %c0_i32_27 : i32
    scf.if %37 {
      %c0_28 = arith.constant 0 : index
      %c0_29 = arith.constant 0 : index
      %38 = vector.load %arg12[%c0_28, %c0_29] : memref<1x256xf32, #tpu.memory_space<vmem>>, vector<1x256xf32>
      %39 = tpu.reciprocal %38 : vector<1x256xf32> -> vector<1x256xf32>
      %c0_30 = arith.constant 0 : index
      %c0_31 = arith.constant 0 : index
      %40 = vector.load %arg13[%c0_30, %c0_31] : memref<32x256xf32, #tpu.memory_space<vmem>>, vector<32x256xf32>
      %41 = vector.broadcast %39 : vector<1x256xf32> to vector<32x256xf32>
      %42 = arith.mulf %40, %41 : vector<32x256xf32>
      %c0_32 = arith.constant 0 : index
      %c0_33 = arith.constant 0 : index
      %43 = memref.load %arg8[%c0_32, %c0_33] : memref<1x1xf32, #tpu.memory_space<smem>>
      %44 = vector.broadcast %43 : f32 to vector<32x256xf32>
      %45 = arith.mulf %44, %42 : vector<32x256xf32>
      %c0_34 = arith.constant 0 : index
      %c0_35 = arith.constant 0 : index
      %c0_36 = arith.constant 0 : index
      %46 = vector.load %arg3[%c0_34, %c0_35, %c0_36] : memref<1x32x256xf32, #tpu.memory_space<vmem>>, vector<1x32x256xf32>
      %47 = vector.shape_cast %46 : vector<1x32x256xf32> to vector<32x256xf32>
      %48 = arith.addf %45, %47 : vector<32x256xf32>
      %c0_37 = arith.constant 0 : index
      %c0_38 = arith.constant 0 : index
      %c0_39 = arith.constant 0 : index
      %49 = vector.load %arg9[%c0_37, %c0_38, %c0_39] : memref<1x32x256xf32, #tpu.memory_space<vmem>>, vector<1x32x256xf32>
      %50 = vector.shape_cast %49 : vector<1x32x256xf32> to vector<32x256xf32>
      %51 = vector.shape_cast %48 : vector<32x256xf32> to vector<1x32x256xf32>
      tpu.vector_store %arg9[%c0_37, %c0_38, %c0_39], %51 {strides = array<i32>} : memref<1x32x256xf32, #tpu.memory_space<vmem>>, vector<1x32x256xf32>,
    } else {
    }
    return
  }
  func.func @transform_0(%arg0: i32, %arg1: i32, %arg2: i32) -> (i32, i32, i32) {
    %c0_i32 = arith.constant 0 : i32
    %c0_i32_0 = arith.constant 0 : i32
    return %arg0, %c0_i32, %arg1 : i32, i32, i32
  }
  func.func @transform_1(%arg0: i32, %arg1: i32, %arg2: i32) -> (i32, i32, i32) {
    %c0_i32 = arith.constant 0 : i32
    %c0_i32_0 = arith.constant 0 : i32
    return %arg0, %c0_i32, %arg2 : i32, i32, i32
  }
  func.func @transform_2(%arg0: i32, %arg1: i32, %arg2: i32) -> (i32, i32, i32) {
    %c0_i32 = arith.constant 0 : i32
    %c0_i32_0 = arith.constant 0 : i32
    return %arg0, %c0_i32, %arg2 : i32, i32, i32
  }
  func.func @transform_3(%arg0: i32, %arg1: i32, %arg2: i32) -> (i32, i32, i32) {
    %c0_i32 = arith.constant 0 : i32
    %c0_i32_0 = arith.constant 0 : i32
    return %arg0, %arg2, %c0_i32 : i32, i32, i32
  }
  func.func @transform_4(%arg0: i32, %arg1: i32, %arg2: i32) -> (i32, i32) {
    %c0_i32 = arith.constant 0 : i32
    %c0_i32_0 = arith.constant 0 : i32
    %c0_i32_1 = arith.constant 0 : i32
    return %c0_i32, %c0_i32_0 : i32, i32
  }
  func.func @transform_5(%arg0: i32, %arg1: i32, %arg2: i32) -> (i32, i32) {
    %c0_i32 = arith.constant 0 : i32
    %c0_i32_0 = arith.constant 0 : i32
    %c0_i32_1 = arith.constant 0 : i32
    return %c0_i32, %c0_i32_0 : i32, i32
  }
  func.func @transform_6(%arg0: i32, %arg1: i32, %arg2: i32) -> (i32, i32, i32) {
    %c0_i32 = arith.constant 0 : i32
    %c0_i32_0 = arith.constant 0 : i32
    return %arg0, %c0_i32, %arg1 : i32, i32, i32
  }
}

</mosaic_0001>

<bundles_post_ra>
// kernel: tpu_custom_call.1
= control target key start
LH: loop header
LB: loop body
LE: loop exit
PB: predicated region body
PF: predicated region fallthrough
CT: control target
= control target key end

     0   :  { %s3316_s0 = inlined_call_operand.vmem [shape: f32[2,32,256], index: 0, kind: input, shape index: {}]   ;;  %s3317_s1 = inlined_call_operand.vmem [shape: f32[2,4,256], index: 1, kind: input, shape index: {}]   ;;  %s3318_s2 = inlined_call_operand.vmem [shape: f32[2,32,256], index: 2, kind: input, shape index: {}]   ;;  %s3319_s3 = inlined_call_operand.vmem [shape: f32[2,256,1], index: 3, kind: input, shape index: {}]   ;;  %s3320_s4 = inlined_call_operand.vmem [shape: f32[4,32], index: 4, kind: input, shape index: {}]   ;;  %s3321_s5 = inlined_call_operand.<no memory space> [shape: f32[1,1], index: 5, kind: input, shape index: {}]   ;;  %s3322_s6 = inlined_call_operand.hbm [shape: f32[2,32,256], index: 6, kind: output, shape index: {}]  }
   0x1   :  { %11 = sst [smem:[#allocation6]] %s3321_s5 }
   0x2   :  { %12 = vsyncpa [#allocation8], 0 }
   0x3   :  { %14 = vsyncpa [#allocation8 + $0x1], 0  ;;  %s2338_s23 = smov 0   ;;  %s2340_s24 = smov 0  }
   0x4   :  { %s2342_s25 = smov 0   ;;  %s2344_s26 = smov 0  }
   0x5   :  { %s2346_s27 = smov 0   ;;  %s2348_s28 = smov 0  }
   0x6 LB: > { %s1885_s5 = sadd.s32 4294967295, %s2291_s28   ;;  %s1886_s29 = sadd.s32 4294967294, %s2291_s28   ;;  %s2291_s28 = sphi %s2348_s28, %s20_s28   ;;  %s2287_s27 = sphi %s2346_s27, %s3466_s27   ;;  %s2283_s26 = sphi %s2344_s26, %s3465_s26   ;;  %s2279_s25 = sphi %s2342_s25, %s3464_s25   ;;  %s2275_s24 = sphi %s2340_s24, %s3463_s24   ;;  %s2271_s23 = sphi %s2338_s23, %s3462_s23  }
   0x7   : > { %s39_s30 = sadd.s32 1, %s2287_s27  ;;  %s202_s7 = sadd.s32 1, %s2279_s25 }
   0x8   : > { %p41_p0 = scmp.ge.s32.totalorder %s39_s30, 2  ;;  %p212_p1 = scmp.ne.s32.totalorder %s2279_s25, %s2275_s24 }
   0x9   : > { %p213_p2 = scmp.eq.s32.totalorder %s1885_s5, 1  ;;  %p218_p3 = scmp.ne.s32.totalorder %s2275_s24, %s2271_s23 }
   0xa   : > { %s3468_s30 = smov (%p41_p0, %s39_s30), 0  ;;  %p219_p5 = scmp.eq.s32.totalorder %s1886_s29, 1 }
   0xb   : > { %p2378_p4 = por %p213_p2, %p212_p1  ;;  %s197_s9 = ssub.s32 %s2287_s27, %s3468_s30 }
   0xc   : > { %p1889_p6 = scmp.ge.s32.totalorder %s2291_s28, 1  ;;  %p200_p7 = scmp.eq.s32.totalorder %s197_s9, 0 }
   0xd   : > { %p2385_p8 = por %p219_p5, %p218_p3  ;;  %p295_p9 = scmp.lt.s32.totalorder %s2291_s28, 3 }
   0xe   : > { %s2391_s11 = scalar_select %p200_p7, %s2279_s25, %s202_s7  }
   0xf   : > { %p296_p10 = pnand %p1889_p6, %p295_p9 }
  0x11   : > { %299 = sbr.rel (%p296_p10) target bundleno = 960 (0x3c0), region = 44 }
  0x18   : > { %p357_p11 = scmp.lt.s32.totalorder %s2283_s26, 1  ;;  %v2293_v0 = vmov 0.0   ;;  %v2294_v1 = vmov 0   ;;  %v401_v17 = vld [vmem:[%s3320_s4] sm:$0xf]  ;;  %vm410_vm0 = vcmask 261120  }
  0x19   : > { %478 = vmatprep.mubr.f32.mxu0 %v2293_v0  ;;  %2078 = vset.pattern.permute.xlu1 %v2294_v1  ;;  %vm872_vm1 = vcmask 1043456   ;;  %vm775_vm2 = vcmask 31744   ;;  %s2297_s7 = smov [#allocation7]  }
  0x1a   : > { %s2396_s12 = scalar_select %p357_p11, %s2283_s26, 1  ;;  %941 = vmatprep.mubr.f32.mxu1 %v2293_v0 }
  0x1b   : > { %s2217_s9 = sshll.u32 %s2297_s7, 4  ;;  %s2218_s9 = int_to_ptr.vmem [resolvable:$false] %s2217_s9 }
  0x1c   : > { %s1939_s13 = sshll.u32 %s2396_s12, 6  ;;  %s1942_s14 = sshll.u32 %s2396_s12, 8 }
  0x1d   : > { %s2406_s17 = scalar_lea.vmem %s3316_s0, %s1939_s13  ;;  %s2411_s20 = scalar_lea.vmem %s3319_s3, %s1942_s14 }
  0x1e   : > { %v403_v2 = vld [vmem:[%s2406_s17 + $0x8] sm:$0xff]  ;;  %v405_v3 = vld [vmem:[%s2406_s17 + $0x18] sm:$0xff]  ;;  %v402_v4 = vld [vmem:[%s2406_s17] sm:$0xff]  ;;  %s1940_s21 = sshll.u32 %s2396_s12, 3  ;;  %s2927_s16 = scalar_lea.vmem %s3318_s2, %s1939_s13 }
  0x1f   : > { %v1945_v5 = vpack.c.bf16 %v405_v3, %v403_v2  ;;  %v404_v6 = vld [vmem:[%s2406_s17 + $0x10] sm:$0xff]  ;;  %v407_v7 = vld [vmem:[%s2406_s17 + $0x28] sm:$0xff]  ;;  %v409_v8 = vld [vmem:[%s2406_s17 + $0x38] sm:$0xff]  ;;  %s374_s29 = scalar_lea.vmem %s3317_s1, %s1940_s21  ;;  %s1699_s12 = sld [smem:[#allocation6]] }
  0x20   : > { %v1947_v9 = vpack.c.bf16 %v404_v6, %v402_v4  ;;  %v1949_v10 = vpack.c.bf16 %v409_v8, %v407_v7  ;;  %v406_v11 = vld [vmem:[%s2406_s17 + $0x20] sm:$0xff]  ;;  %v408_v12 = vld [vmem:[%s2406_s17 + $0x30] sm:$0xff]  ;;  %v515_v16 = vld [vmem:[%s2411_s20 + $0x8] sm:$0xff]  ;;  %s353_s13 = sand.u32 1, %s2275_s24   ;;  %s2219_s14 = scalar_lea.vmem %s2218_s9, 2048 }
  0x21   : > { %v504_v13 = vld [vmem:[%s374_s29] sm:$0xff]  ;;  %1946 = vmatprep.subr.bf16.mxu0 %v1945_v5  ;;  %v1951_v15 = vpack.c.bf16 %v408_v12, %v406_v11  ;;  %v516_v18 = vld [vmem:[%s2411_s20 + $0x10] sm:$0xff]  ;;  %v517_v19 = vld [vmem:[%s2411_s20 + $0x18] sm:$0xff]  ;;  %s1890_s18 = sshll.u32 %s353_s13, 6 }
  0x22   : > { %709 = vxpose.xlu0.b32.start.end [1/1] (short) %v504_v13, 128  ;;  %v514_v14 = vld [vmem:[%s2411_s20] sm:$0xff]  ;;  %1948 = vmatpush1.bf16.msra.mxu0 %v1947_v9  ;;  %v519_v21 = vld [vmem:[%s2411_s20 + $0x28] sm:$0xff]  ;;  %v520_v22 = vld [vmem:[%s2411_s20 + $0x30] sm:$0xff]  ;;  %v707_v23 = vcombine.high %v504_v13, %v504_v13  ;;  %s3244_s19 = scalar_lea.vmem [#allocation7], %s1890_s18 }
  0x23   : > { %548 = vperm.xlu1 %2078, %v514_v14   ;;  %1950 = vmatprep.subr.bf16.mxu0 %v1949_v10  ;;  %v518_v20 = vld [vmem:[%s2411_s20 + $0x20] sm:$0xff]  ;;  %v521_v24 = vld [vmem:[%s2411_s20 + $0x38] sm:$0xff]  ;;  %v523_v26 = vld [vmem:[%s2411_s20 + $0x48] sm:$0xff]  ;;  %s1749_s21 = sshll.u32 %s3244_s19, 4  ;;  %s3264_s21 = int_to_ptr.vmem [resolvable:$true] %s1749_s21 }
  0x24   : > { %v522_v25 = vld [vmem:[%s2411_s20 + $0x40] sm:$0xff]  ;;  %v524_v27 = vld [vmem:[%s2411_s20 + $0x50] sm:$0xff]  ;;  %v525_v28 = vld [vmem:[%s2411_s20 + $0x58] sm:$0xff]  ;;  %p2220_p1 = scmp.lt.s32.totalorder %s3264_s21, %s2218_s9 }
  0x25   : > { %v526_v29 = vld [vmem:[%s2411_s20 + $0x60] sm:$0xff]  ;;  %v527_v30 = vld [vmem:[%s2411_s20 + $0x68] sm:$0xff]  ;;  %v528_v31 = vld [vmem:[%s2411_s20 + $0x70] sm:$0xff] }
  0x26   : > { %1952 = vmatpush1.bf16.msra.mxu0 %v1951_v15  ;;  %v529_v32 = vld [vmem:[%s2411_s20 + $0x78] sm:$0xff]  ;;  %v530_v33 = vld [vmem:[%s2411_s20 + $0x80] sm:$0xff]  ;;  %v532_v34 = vld [vmem:[%s2411_s20 + $0x90] sm:$0xff] }
  0x27   : > { %553 = vperm.xlu1 %2078, %v515_v16   ;;  %v533_v35 = vld [vmem:[%s2411_s20 + $0x98] sm:$0xff]  ;;  %v534_v36 = vld [vmem:[%s2411_s20 + $0xa0] sm:$0xff]  ;;  %v535_v37 = vld [vmem:[%s2411_s20 + $0xa8] sm:$0xff] }
  0x28   : > { %v536_v38 = vld [vmem:[%s2411_s20 + $0xb0] sm:$0xff]  ;;  %v537_v39 = vld [vmem:[%s2411_s20 + $0xb8] sm:$0xff]  ;;  %v538_v40 = vld [vmem:[%s2411_s20 + $0xc0] sm:$0xff] }
  0x29   : > { %1899 = vmatmul.mubr.msk.f32.vlgmr.msra.gmra.mrb[0].mxu0 %vm410_vm0, %v401_v17  ;;  %v539_v42 = vld [vmem:[%s2411_s20 + $0xc8] sm:$0xff]  ;;  %v540_v43 = vld [vmem:[%s2411_s20 + $0xd0] sm:$0xff]  ;;  %v541_v45 = vld [vmem:[%s2411_s20 + $0xd8] sm:$0xff] }
  0x2a   : > { %v542_v47 = vld [vmem:[%s2411_s20 + $0xe0] sm:$0xff]  ;;  %v543_v48 = vld [vmem:[%s2411_s20 + $0xe8] sm:$0xff]  ;;  %v544_v50 = vld [vmem:[%s2411_s20 + $0xf0] sm:$0xff] }
  0x2b   : > { %558 = vperm.xlu1 %2078, %v516_v18   ;;  %v545_v52 = vld [vmem:[%s2411_s20 + $0xf8] sm:$0xff]  ;;  %v531_v63 = vld [vmem:[%s2411_s20 + $0x88] sm:$0xff]  ;;  %s1943_s20 = sshll.u32 %s2283_s26, 10  ;;  %s3270_s26 = scalar_lea.sflag [#allocation8], %s353_s13 }
  0x2c   : > { %s3262_s29 = scalar_lea.hbm %s3322_s6, %s1943_s20 }
  0x2f   : > { %563 = vperm.xlu1 %2078, %v517_v19  }
  0x33   : > { %568 = vperm.xlu1 %2078, %v518_v20  }
  0x37   : > { %573 = vperm.xlu1 %2078, %v519_v21  }
  0x3b   : > { %578 = vperm.xlu1 %2078, %v520_v22  }
  0x3f   : > { %583 = vperm.xlu1 %2078, %v521_v24  }
  0x43   : > { %588 = vperm.xlu1 %2078, %v522_v25  }
  0x47   : > { %593 = vperm.xlu1 %2078, %v523_v26  }
  0x4b   : > { %598 = vperm.xlu1 %2078, %v524_v27  }
  0x4f   : > { %603 = vperm.xlu1 %2078, %v525_v28  }
  0x53   : > { %608 = vperm.xlu1 %2078, %v526_v29  }
  0x57   : > { %613 = vperm.xlu1 %2078, %v527_v30  }
  0x5b   : > { %618 = vperm.xlu1 %2078, %v528_v31  }
  0x5f   : > { %741 = vxpose.xlu0.b32.start.end [1/1] (short) %v707_v23, 128  ;;  %623 = vperm.xlu1 %2078, %v529_v32  }
  0x63   : > { %628 = vperm.xlu1 %2078, %v530_v33  }
  0x67   : > { %638 = vperm.xlu1 %2078, %v532_v34  }
  0x6b   : > { %643 = vperm.xlu1 %2078, %v533_v35  }
  0x6f   : > { %648 = vperm.xlu1 %2078, %v534_v36  }
  0x73   : > { %653 = vperm.xlu1 %2078, %v535_v37  }
  0x77   : > { %658 = vperm.xlu1 %2078, %v536_v38  }
  0x7b   : > { %663 = vperm.xlu1 %2078, %v537_v39  }
  0x7f   : > { %668 = vperm.xlu1 %2078, %v538_v40   ;;  %v3323_v40 = vlaneseq }
  0x81   : > { %vm2556_vm3 = vcmp.lt.s32.totalorder %v3323_v40, 256 }
  0x82   : > { %495 = vst.msk [vmem:[#allocation4] sm:$0x3] %vm2556_vm3, %v2293_v0 }
  0x83   : > { %673 = vperm.xlu1 %2078, %v539_v42  }
  0x87   : > { %678 = vperm.xlu1 %2078, %v540_v43   ;;  %v3368_v43 = vmov 0 }
  0x88   : > { %2079 = vset.pattern.permute.xlu0 %v2294_v1  ;;  %v3369_v43 = vsel %vm2556_vm3, 4294967295, %v3368_v43 }
  0x89   : > { %3370 = vst [vmem:[#allocation10_spill] sm:$0xff] %v3369_v43 }
  0x8b   : > { %683 = vperm.xlu1 %2078, %v541_v45  }
  0x8f   : > { %688 = vperm.xlu1 %2078, %v542_v47  }
  0x93   : > { %693 = vperm.xlu1 %2078, %v543_v48  }
  0x97   : > { %698 = vperm.xlu1 %2078, %v544_v50  }
  0x9b   : > { %703 = vperm.xlu1 %2078, %v545_v52  }
  0xa2   : > { %v725_v41 = vpop.trf.xlu0  ;;  %v2523_v22 = vpop.permute.xlu1 %548 }
  0xa6   : > { %v726_v44 = vpop.trf.xlu0  ;;  %v2525_v23 = vpop.permute.xlu1 %553 }
  0xaa   : > { %v727_v46 = vpop.trf.xlu0  ;;  %v2527_v24 = vpop.permute.xlu1 %558 }
  0xae   : > { %v728_v49 = vpop.trf.xlu0  ;;  %v2529_v25 = vpop.permute.xlu1 %563 }
  0xb2   : > { %v729_v51 = vpop.trf.xlu0  ;;  %v2531_v26 = vpop.permute.xlu1 %568 }
  0xb6   : > { %v730_v53 = vpop.trf.xlu0  ;;  %v2533_v27 = vpop.permute.xlu1 %573 }
  0xba   : > { %v731_v54 = vpop.trf.xlu0  ;;  %v2535_v28 = vpop.permute.xlu1 %578 }
  0xbe   : > { %v732_v55 = vpop.trf.xlu0  ;;  %v2537_v29 = vpop.permute.xlu1 %583 }
  0xc2   : > { %v733_v56 = vpop.trf.xlu0  ;;  %v589_v30 = vpop.permute.xlu1 %588 }
  0xc4   : > { %633 = vperm.xlu0 %2079, %v531_v63  }
  0xc6   : > { %v734_v57 = vpop.trf.xlu0  ;;  %v2539_v31 = vpop.permute.xlu1 %593 }
  0xca   : > { %v735_v60 = vpop.trf.xlu0  ;;  %v2545_v34 = vpop.permute.xlu1 %598 }
  0xce   : > { %v736_v1 = vpop.trf.xlu0  ;;  %v2553_v39 = vpop.permute.xlu1 %603 }
  0xd2   : > { %v737_v2 = vpop.trf.xlu0  ;;  %v2565_v45 = vpop.permute.xlu1 %608 }
  0xd6   : > { %v738_v3 = vpop.trf.xlu0  ;;  %v2569_v50 = vpop.permute.xlu1 %613 }
  0xda   : > { %v739_v4 = vpop.trf.xlu0 }
  0xde   : > { %v740_v5 = vpop.trf.xlu0 }
  0xe2   : > { %v757_v6 = vpop.trf.xlu0 }
  0xe6   : > { %v758_v7 = vpop.trf.xlu0 }
  0xea   : > { %v759_v8 = vpop.trf.xlu0 }
  0xee   : > { %v760_v9 = vpop.trf.xlu0 }
  0xf2   : > { %v761_v10 = vpop.trf.xlu0 }
  0xf6   : > { %v762_v11 = vpop.trf.xlu0 }
  0xfa   : > { %v763_v12 = vpop.trf.xlu0 }
  0xfc   : > { %v480_v58 = vpop.f32.mrb[0].mxu0 }
  0xfd   : > { %v482_v59 = vpop.f32.mrb[1].mxu0 }
  0xfe   : > { %v487_v61 = vcombine.low %v480_v58, %v482_v59  ;;  %v1944_v62 = vcombine.low %v482_v59, %v482_v59  ;;  %v764_v13 = vpop.trf.xlu0 }
 0x100   : > { %1900 = vmatprep.subr.msk.mxu1 %vm872_vm1, %v1944_v62 }
 0x101   : > { %1901 = vmatpush1.msk.msra.mxu1 %vm872_vm1, %v487_v61 }
 0x102   : > { %1902 = vmatmul.mubr.msk.f32.vlgmr.msra.gmra.mrb[0].mxu1 %vm775_vm2, %v725_v41  ;;  %v765_v14 = vpop.trf.xlu0 }
 0x103   : > { %947 = vmatprep.mubr.f32.mxu1 %v2293_v0 }
 0x106   : > { %1903 = vmatmul.mubr.msk.f32.gmra.mrb[2].mxu1 %vm775_vm2, %v726_v44  ;;  %v766_v15 = vpop.trf.xlu0  ;;  %v2295_v44 = vmov -inf  }
 0x107   : > { %953 = vmatprep.mubr.f32.mxu1 %v2293_v0  ;;  %494 = vst.msk [vmem:[#allocation3] sm:$0x3] %vm2556_vm3, %v2295_v44 }
 0x10a   : > { %1904 = vmatmul.mubr.msk.f32.gmra.mrb[4].mxu1 %vm775_vm2, %v727_v46  ;;  %v767_v16 = vpop.trf.xlu0 }
 0x10b   : > { %959 = vmatprep.mubr.f32.mxu1 %v2293_v0 }
 0x10e   : > { %1905 = vmatmul.mubr.msk.f32.gmra.mrb[6].mxu1 %vm775_vm2, %v728_v49  ;;  %v768_v17 = vpop.trf.xlu0 }
 0x10f   : > { %965 = vmatprep.mubr.f32.mxu1 %v2293_v0 }
 0x112   : > { %1906 = vmatmul.mubr.msk.f32.gmra.mrb[8].mxu1 %vm775_vm2, %v729_v51  ;;  %v769_v18 = vpop.trf.xlu0 }
 0x113   : > { %971 = vmatprep.mubr.f32.mxu1 %v2293_v0 }
 0x116   : > { %1907 = vmatmul.mubr.msk.f32.gmra.mrb[10].mxu1 %vm775_vm2, %v730_v53  ;;  %v770_v19 = vpop.trf.xlu0  ;;  %v2575_v53 = vpop.permute.xlu1 %618 }
 0x117   : > { %977 = vmatprep.mubr.f32.mxu1 %v2293_v0 }
 0x11a   : > { %1908 = vmatmul.mubr.msk.f32.gmra.mrb[12].mxu1 %vm775_vm2, %v731_v54  ;;  %v771_v20 = vpop.trf.xlu0  ;;  %v2579_v58 = vpop.permute.xlu1 %623 }
 0x11b   : > { %983 = vmatprep.mubr.f32.mxu1 %v2293_v0 }
 0x11e   : > { %1909 = vmatmul.mubr.msk.f32.gmra.mrb[14].mxu1 %vm775_vm2, %v732_v55  ;;  %v772_v21 = vpop.trf.xlu0  ;;  %v2583_v62 = vpop.permute.xlu1 %628 }
 0x11f   : > { %989 = vmatprep.mubr.f32.mxu1 %v2293_v0 }
 0x122   : > { %1910 = vmatmul.mubr.msk.f32.gmra.mrb[16].mxu1 %vm775_vm2, %v733_v56 }
 0x123   : > { %995 = vmatprep.mubr.f32.mxu1 %v2293_v0 }
 0x126   : > { %1911 = vmatmul.mubr.msk.f32.gmra.mrb[18].mxu1 %vm775_vm2, %v734_v57 }
 0x127   : > { %1001 = vmatprep.mubr.f32.mxu1 %v2293_v0 }
 0x12a   : > { %1912 = vmatmul.mubr.msk.f32.gmra.mrb[20].mxu1 %vm775_vm2, %v735_v60 }
 0x12b   : > { %1007 = vmatprep.mubr.f32.mxu1 %v2293_v0 }
 0x12e   : > { %1913 = vmatmul.mubr.msk.f32.gmra.mrb[22].mxu1 %vm775_vm2, %v736_v1 }
 0x12f   : > { %1013 = vmatprep.mubr.f32.mxu1 %v2293_v0 }
 0x132   : > { %1914 = vmatmul.mubr.msk.f32.gmra.mrb[24].mxu1 %vm775_vm2, %v737_v2 }
 0x133   : > { %1019 = vmatprep.mubr.f32.mxu1 %v2293_v0 }
 0x136   : > { %1915 = vmatmul.mubr.msk.f32.gmra.mrb[26].mxu1 %vm775_vm2, %v738_v3 }
 0x137   : > { %1025 = vmatprep.mubr.f32.mxu1 %v2293_v0 }
 0x13a   : > { %1916 = vmatmul.mubr.msk.f32.gmra.mrb[28].mxu1 %vm775_vm2, %v739_v4  ;;  %v2589_v4 = vpop.permute.xlu1 %638 }
 0x13b   : > { %1031 = vmatprep.mubr.f32.mxu1 %v2293_v0 }
 0x13e   : > { %1917 = vmatmul.mubr.msk.f32.gmra.mrb[30].mxu1 %vm775_vm2, %v740_v5 }
 0x13f   : > { %1037 = vmatprep.mubr.f32.mxu1 %v2293_v0 }
 0x142   : > { %1918 = vmatmul.mubr.msk.f32.gmra.mrb[32].mxu1 %vm775_vm2, %v757_v6 }
 0x143   : > { %1043 = vmatprep.mubr.f32.mxu1 %v2293_v0 }
 0x146   : > { %1919 = vmatmul.mubr.msk.f32.gmra.mrb[34].mxu1 %vm775_vm2, %v758_v7  ;;  %v2595_v7 = vpop.permute.xlu1 %643 }
 0x147   : > { %1049 = vmatprep.mubr.f32.mxu1 %v2293_v0 }
 0x14a   : > { %1920 = vmatmul.mubr.msk.f32.gmra.mrb[36].mxu1 %vm775_vm2, %v759_v8 }
 0x14b   : > { %1055 = vmatprep.mubr.f32.mxu1 %v2293_v0 }
 0x14e   : > { %1921 = vmatmul.mubr.msk.f32.gmra.mrb[38].mxu1 %vm775_vm2, %v760_v9 }
 0x14f   : > { %1061 = vmatprep.mubr.f32.mxu1 %v2293_v0 }
 0x152   : > { %1922 = vmatmul.mubr.msk.f32.gmra.mrb[40].mxu1 %vm775_vm2, %v761_v10 }
 0x153   : > { %1067 = vmatprep.mubr.f32.mxu1 %v2293_v0 }
 0x156   : > { %1923 = vmatmul.mubr.msk.f32.gmra.mrb[42].mxu1 %vm775_vm2, %v762_v11 }
 0x157   : > { %1073 = vmatprep.mubr.f32.mxu1 %v2293_v0 }
 0x15a   : > { %1924 = vmatmul.mubr.msk.f32.gmra.mrb[44].mxu1 %vm775_vm2, %v763_v12  ;;  %v2603_v12 = vpop.permute.xlu1 %648 }
 0x15b   : > { %1079 = vmatprep.mubr.f32.mxu1 %v2293_v0  ;;  %3371 = vst [vmem:[#allocation11_spill] sm:$0xff] %v2603_v12 }
 0x15e   : > { %1925 = vmatmul.mubr.msk.f32.gmra.mrb[46].mxu1 %vm775_vm2, %v764_v13 }
 0x15f   : > { %1085 = vmatprep.mubr.f32.mxu1 %v2293_v0 }
 0x162   : > { %1926 = vmatmul.mubr.msk.f32.gmra.mrb[48].mxu1 %vm775_vm2, %v765_v14 }
 0x163   : > { %1091 = vmatprep.mubr.f32.mxu1 %v2293_v0 }
 0x166   : > { %1927 = vmatmul.mubr.msk.f32.gmra.mrb[50].mxu1 %vm775_vm2, %v766_v15  ;;  %v2609_v15 = vpop.permute.xlu1 %653 }
 0x167   : > { %1097 = vmatprep.mubr.f32.mxu1 %v2293_v0  ;;  %3372 = vst [vmem:[#allocation12_spill] sm:$0xff] %v2609_v15 }
 0x16a   : > { %1928 = vmatmul.mubr.msk.f32.gmra.mrb[52].mxu1 %vm775_vm2, %v767_v16 }
 0x16b   : > { %1103 = vmatprep.mubr.f32.mxu1 %v2293_v0 }
 0x16e   : > { %1929 = vmatmul.mubr.msk.f32.gmra.mrb[54].mxu1 %vm775_vm2, %v768_v17 }
 0x16f   : > { %1109 = vmatprep.mubr.f32.mxu1 %v2293_v0 }
 0x172   : > { %1930 = vmatmul.mubr.msk.f32.gmra.mrb[56].mxu1 %vm775_vm2, %v769_v18 }
 0x173   : > { %1115 = vmatprep.mubr.f32.mxu1 %v2293_v0 }
 0x176   : > { %1931 = vmatmul.mubr.msk.f32.gmra.mrb[58].mxu1 %vm775_vm2, %v770_v19 }
 0x177   : > { %1121 = vmatprep.mubr.f32.mxu1 %v2293_v0 }
 0x17a   : > { %1932 = vmatmul.mubr.msk.f32.gmra.mrb[60].mxu1 %vm775_vm2, %v771_v20  ;;  %v2619_v20 = vpop.permute.xlu1 %658 }
 0x17b   : > { %1127 = vmatprep.mubr.f32.mxu1 %v2293_v0  ;;  %3373 = vst [vmem:[#allocation13_spill] sm:$0xff] %v2619_v20 }
 0x17e   : > { %1933 = vmatmul.mubr.msk.f32.gmra.mrb[62].mxu1 %vm775_vm2, %v772_v21  ;;  %v2625_v44 = vpop.permute.xlu1 %663 }
 0x17f   : > { %3376 = vst [vmem:[#allocation16_spill] sm:$0xff] %v2625_v44 }
 0x182   : > { %v2635_v12 = vpop.permute.xlu1 %668 }
 0x1d5   : > { %v2541_v32 = vpop.f32.mrb[0].mxu1 }
 0x1d6   : > { %v2543_v33 = vpop.f32.mrb[1].mxu1 }
 0x1d9   : > { %v2547_v35 = vpop.f32.mrb[2].mxu1 }
 0x1da   : > { %v2549_v36 = vpop.f32.mrb[3].mxu1  ;;  %v2647_v44 = vadd.f32 %v2547_v35, %v2525_v23  ;;  %v2670_v35 = vadd.f32 %v2541_v32, %v2523_v22 }
 0x1dd   : > { %v955_v37 = vpop.f32.mrb[4].mxu1 }
 0x1de   : > { %v2551_v38 = vpop.f32.mrb[5].mxu1 }
 0x1e1   : > { %v961_v41 = vpop.f32.mrb[6].mxu1 }
 0x1e2   : > { %v963_v42 = vpop.f32.mrb[7].mxu1  ;;  %v2638_v15 = vadd.f32 %v961_v41, %v2529_v25  ;;  %v2659_v41 = vadd.f32 %v2549_v36, %v2525_v23  ;;  %v2680_v36 = vpop.permute.xlu1 %673 }
 0x1e3   : > { %v2641_v20 = vadd.f32 %v963_v42, %v2529_v25  ;;  %v2663_v25 = vadd.f32 %v2551_v38, %v2527_v24 }
 0x1e4   : > { %3379 = vst [vmem:[#allocation19_spill] sm:$0xff] %v2638_v15 }
 0x1e5   : > { %v967_v46 = vpop.f32.mrb[8].mxu1  ;;  %3380 = vst [vmem:[#allocation20_spill] sm:$0xff] %v2641_v20 }
 0x1e6   : > { %v2567_v47 = vpop.f32.mrb[9].mxu1 }
 0x1e7   : > { %v2690_v32 = vadd.f32 %v2567_v47, %v2531_v26 }
 0x1e9   : > { %v973_v48 = vpop.f32.mrb[10].mxu1 }
 0x1ea   : > { %v975_v49 = vpop.f32.mrb[11].mxu1 }
 0x1eb   : > { %v2666_v42 = vadd.f32 %v975_v49, %v2533_v27 }
 0x1ed   : > { %v2571_v51 = vpop.f32.mrb[12].mxu1  ;;  %3382 = vst [vmem:[#allocation22_spill] sm:$0xff] %v2666_v42 }
 0x1ee   : > { %v2573_v52 = vpop.f32.mrb[13].mxu1 }
 0x1ef   : > { %v2714_v47 = vadd.f32 %v2573_v52, %v2535_v28 }
 0x1f1   : > { %v985_v54 = vpop.f32.mrb[14].mxu1 }
 0x1f2   : > { %v987_v55 = vpop.f32.mrb[15].mxu1  ;;  %v2678_v23 = vadd.f32 %v985_v54, %v2537_v29 }
 0x1f3   : > { %v2693_v38 = vadd.f32 %v987_v55, %v2537_v29 }
 0x1f5   : > { %v991_v56 = vpop.f32.mrb[16].mxu1 }
 0x1f6   : > { %v2577_v57 = vadd.f32 %v991_v56, %v589_v30  ;;  %v993_v0 = vpop.f32.mrb[17].mxu1 }
 0x1f7   : > { %v2581_v59 = vadd.f32 %v993_v0, %v589_v30 }
 0x1f9   : > { %v997_v60 = vpop.f32.mrb[18].mxu1 }
 0x1fa   : > { %v999_v61 = vpop.f32.mrb[19].mxu1 }
 0x1fb   : > { %v2717_v55 = vadd.f32 %v999_v61, %v2539_v31 }
 0x1fd   : > { %v2585_v63 = vpop.f32.mrb[20].mxu1 }
 0x1fe   : > { %v2587_v1 = vpop.f32.mrb[21].mxu1  ;;  %v2733_v52 = vadd.f32 %v2585_v63, %v2545_v34  ;;  %v634_v63 = vpop.permute.xlu0 %633 }
 0x201   : > { %v1009_v2 = vpop.f32.mrb[22].mxu1 }
 0x202   : > { %v1011_v3 = vpop.f32.mrb[23].mxu1 }
 0x205   : > { %v2591_v5 = vpop.f32.mrb[24].mxu1 }
 0x206   : > { %v2593_v6 = vpop.f32.mrb[25].mxu1 }
 0x209   : > { %v1021_v8 = vpop.f32.mrb[26].mxu1 }
 0x20a   : > { %v2597_v9 = vpop.f32.mrb[27].mxu1  ;;  %v2736_v61 = vadd.f32 %v1021_v8, %v2569_v50 }
 0x20d   : > { %v2599_v10 = vpop.f32.mrb[28].mxu1 }
 0x20e   : > { %v2601_v11 = vpop.f32.mrb[29].mxu1 }
 0x211   : > { %v2605_v13 = vpop.f32.mrb[30].mxu1 }
 0x212   : > { %v2607_v14 = vpop.f32.mrb[31].mxu1 }
 0x215   : > { %v2611_v16 = vpop.f32.mrb[32].mxu1 }
 0x216   : > { %v2613_v17 = vpop.f32.mrb[33].mxu1 }
 0x219   : > { %v2615_v18 = vpop.f32.mrb[34].mxu1 }
 0x21a   : > { %v2617_v19 = vpop.f32.mrb[35].mxu1 }
 0x21d   : > { %v2621_v21 = vpop.f32.mrb[36].mxu1 }
 0x21e   : > { %3374 = vst [vmem:[#allocation14_spill] sm:$0xff] %v2621_v21  ;;  %v2623_v30 = vpop.f32.mrb[37].mxu1 }
 0x21f   : > { %3375 = vst [vmem:[#allocation15_spill] sm:$0xff] %v2623_v30  ;;  %v2650_v30 = vadd.f32 %v955_v37, %v2527_v24  ;;  %v1136_v37 = vmax.f32 %v2647_v44, %v2638_v15  ;;  %v2684_v24 = vadd.f32 %v2543_v33, %v2523_v22  ;;  %v2702_v22 = vadd.f32 %v2571_v51, %v2535_v28 }
 0x220   : > { %v2705_v33 = vadd.f32 %v997_v60, %v2539_v31  ;;  %v2722_v60 = vadd.f32 %v1009_v2, %v2553_v39 }
 0x221   : > { %v2627_v56 = vpop.f32.mrb[38].mxu1  ;;  %v1135_v49 = vmax.f32 %v2670_v35, %v2650_v30 }
 0x222   : > { %v2629_v0 = vpop.f32.mrb[39].mxu1 }
 0x225   : > { %v2631_v40 = vpop.f32.mrb[40].mxu1 }
 0x226   : > { %3377 = vst [vmem:[#allocation17_spill] sm:$0xff] %v2631_v40  ;;  %v2633_v43 = vpop.f32.mrb[41].mxu1  ;;  %v2653_v40 = vadd.f32 %v973_v48, %v2533_v27  ;;  %v2675_v48 = vadd.f32 %v967_v46, %v2531_v26  ;;  %v1173_v27 = vmax.f32 %v2659_v41, %v2641_v20  ;;  %v1172_v26 = vmax.f32 %v2684_v24, %v2663_v25 }
 0x227   : > { %3378 = vst [vmem:[#allocation18_spill] sm:$0xff] %v2633_v43 }
 0x228   : > { %3381 = vst [vmem:[#allocation21_spill] sm:$0xff] %v2653_v40  ;;  %v1138_v54 = vmax.f32 %v1136_v37, %v2653_v40  ;;  %v1175_v29 = vmax.f32 %v1173_v27, %v2666_v42  ;;  %v1137_v51 = vmax.f32 %v1135_v49, %v2675_v48  ;;  %v1174_v40 = vmax.f32 %v1172_v26, %v2690_v32  ;;  %v2738_v49 = vpop.permute.xlu1 %678 }
 0x229   : > { %v2643_v21 = vpop.f32.mrb[42].mxu1  ;;  %v2727_v27 = vadd.f32 %v1011_v3, %v2553_v39  ;;  %v2744_v3 = vadd.f32 %v2587_v1, %v2545_v34  ;;  %v2748_v26 = vadd.f32 %v2597_v9, %v2569_v50  ;;  %v2764_v50 = vadd.f32 %v2593_v6, %v2565_v45 }
 0x22a   : > { %v2655_v43 = vpop.f32.mrb[43].mxu1  ;;  %v1140_v37 = vmax.f32 %v1138_v54, %v2678_v23  ;;  %v1177_v15 = vmax.f32 %v1175_v29, %v2693_v38  ;;  %v1139_v28 = vmax.f32 %v1137_v51, %v2702_v22  ;;  %v1176_v54 = vmax.f32 %v1174_v40, %v2714_v47 }
 0x22b   : > { %v2754_v51 = vadd.f32 %v2591_v5, %v2565_v45  ;;  %v2758_v40 = vadd.f32 %v2605_v13, %v2579_v58  ;;  %v2768_v9 = vadd.f32 %v2607_v14, %v2579_v58  ;;  %v2774_v13 = vadd.f32 %v2599_v10, %v2575_v53 }
 0x22c   : > { %v1142_v31 = vmax.f32 %v1140_v37, %v2705_v33  ;;  %v1179_v39 = vmax.f32 %v1177_v15, %v2717_v55  ;;  %v1141_v29 = vmax.f32 %v1139_v28, %v2577_v57  ;;  %v1178_v34 = vmax.f32 %v1176_v54, %v2581_v59 }
 0x22d   : > { %v2695_v46 = vpop.f32.mrb[44].mxu1  ;;  %3383 = vst [vmem:[#allocation23_spill] sm:$0xff] %v2768_v9  ;;  %v2777_v28 = vadd.f32 %v2615_v18, %v634_v63  ;;  %v2783_v58 = vadd.f32 %v2601_v11, %v2575_v53  ;;  %v2786_v14 = vadd.f32 %v2617_v19, %v634_v63  ;;  %v2792_v18 = vadd.f32 %v2611_v16, %v2583_v62 }
 0x22e   : > { %v2707_v20 = vpop.f32.mrb[45].mxu1  ;;  %v1144_v8 = vmax.f32 %v1142_v31, %v2722_v60  ;;  %v1181_v1 = vmax.f32 %v1179_v39, %v2727_v27  ;;  %v1143_v5 = vmax.f32 %v1141_v29, %v2733_v52  ;;  %v1180_v45 = vmax.f32 %v1178_v34, %v2744_v3  ;;  %v684_v29 = vpop.permute.xlu1 %683 }
 0x22f   : > { %3384 = vst [vmem:[#allocation24_spill] sm:$0xff] %v2777_v28  ;;  %3385 = vst [vmem:[#allocation25_spill] sm:$0xff] %v2786_v14  ;;  %v2796_v39 = vadd.f32 %v2627_v56, %v2595_v7  ;;  %v2802_v11 = vadd.f32 %v2613_v17, %v2583_v62  ;;  %v2806_v19 = vadd.f32 %v2629_v0, %v2595_v7  ;;  %v3390_v56 = vld [vmem:[#allocation14_spill] sm:$0xff]  ;;  %v3394_v7 = vld [vmem:[#allocation15_spill] sm:$0xff] }
 0x230   : > { %v1146_v37 = vmax.f32 %v1144_v8, %v2736_v61  ;;  %v1183_v6 = vmax.f32 %v1181_v1, %v2748_v26  ;;  %v1145_v54 = vmax.f32 %v1143_v5, %v2754_v51  ;;  %3386 = vst [vmem:[#allocation26_spill] sm:$0xff] %v2792_v18  ;;  %v1182_v8 = vmax.f32 %v1180_v45, %v2764_v50  ;;  %v3392_v5 = vld [vmem:[#allocation12_spill] sm:$0xff] }
 0x231   : > { %v1081_v42 = vpop.f32.mrb[46].mxu1  ;;  %3387 = vst [vmem:[#allocation27_spill] sm:$0xff] %v2796_v39  ;;  %3388 = vst [vmem:[#allocation28_spill] sm:$0xff] %v2802_v11  ;;  %v2812_v1 = vadd.f32 %v3390_v56, %v2589_v4  ;;  %v2822_v0 = vadd.f32 %v3394_v7, %v2589_v4  ;;  %v3397_v56 = vld [vmem:[#allocation11_spill] sm:$0xff]  ;;  %v3402_v7 = vld [vmem:[#allocation18_spill] sm:$0xff] }
 0x232   : > { %v1083_v2 = vpop.f32.mrb[47].mxu1  ;;  %v1148_v10 = vmax.f32 %v1146_v37, %v2758_v40  ;;  %v1185_v53 = vmax.f32 %v1183_v6, %v2768_v9  ;;  %3389 = vst [vmem:[#allocation29_spill] sm:$0xff] %v2806_v19  ;;  %v1147_v16 = vmax.f32 %v1145_v54, %v2774_v13  ;;  %v2816_v37 = vadd.f32 %v2643_v21, %v3392_v5  ;;  %v3398_v21 = vld [vmem:[#allocation17_spill] sm:$0xff]  ;;  %v3400_v9 = vld [vmem:[#allocation16_spill] sm:$0xff] }
 0x233   : > { %3391 = vst [vmem:[#allocation14_spill] sm:$0xff] %v2812_v1  ;;  %v1184_v62 = vmax.f32 %v1182_v8, %v2783_v58  ;;  %3395 = vst [vmem:[#allocation15_spill] sm:$0xff] %v2822_v0  ;;  %v2826_v6 = vadd.f32 %v2655_v43, %v3392_v5  ;;  %v2835_v8 = vadd.f32 %v1081_v42, %v3400_v9 }
 0x234   : > { %v1150_v34 = vmax.f32 %v1148_v10, %v2777_v28  ;;  %3393 = vst [vmem:[#allocation12_spill] sm:$0xff] %v2816_v37  ;;  %v1187_v17 = vmax.f32 %v1185_v53, %v2786_v14  ;;  %v1149_v54 = vmax.f32 %v1147_v16, %v2792_v18  ;;  %v2832_v28 = vadd.f32 %v3398_v21, %v3397_v56  ;;  %v3405_v21 = vld [vmem:[#allocation13_spill] sm:$0xff] }
 0x235   : > { %v1087_v15 = vpop.f32.mrb[48].mxu1  ;;  %3396 = vst [vmem:[#allocation30_spill] sm:$0xff] %v2826_v6  ;;  %3401 = vst [vmem:[#allocation17_spill] sm:$0xff] %v2835_v8  ;;  %v1186_v53 = vmax.f32 %v1184_v62, %v2802_v11  ;;  %v2841_v14 = vadd.f32 %v3402_v7, %v3397_v56  ;;  %v2844_v43 = vadd.f32 %v1083_v2, %v3400_v9 }
 0x236   : > { %v1089_v31 = vpop.f32.mrb[49].mxu1  ;;  %v1152_v10 = vmax.f32 %v1150_v34, %v2796_v39  ;;  %3399 = vst [vmem:[#allocation11_spill] sm:$0xff] %v2832_v28  ;;  %v1189_v4 = vmax.f32 %v1187_v17, %v2806_v19  ;;  %v1151_v34 = vmax.f32 %v1149_v54, %v2812_v1  ;;  %v2850_v42 = vadd.f32 %v2695_v46, %v3405_v21  ;;  %v689_v19 = vpop.permute.xlu1 %688 }
 0x237   : > { %3403 = vst [vmem:[#allocation16_spill] sm:$0xff] %v2841_v14  ;;  %3404 = vst [vmem:[#allocation18_spill] sm:$0xff] %v2844_v43  ;;  %v1188_v56 = vmax.f32 %v1186_v53, %v2822_v0  ;;  %v2859_v2 = vadd.f32 %v2707_v20, %v3405_v21 }
 0x238   : > { %v1154_v5 = vmax.f32 %v1152_v10, %v2816_v37  ;;  %3406 = vst [vmem:[#allocation13_spill] sm:$0xff] %v2850_v42  ;;  %v1191_v7 = vmax.f32 %v1189_v4, %v2826_v6  ;;  %v1153_v54 = vmax.f32 %v1151_v34, %v2832_v28  ;;  %v2872_v4 = vadd.f32 %v1089_v31, %v2635_v12 }
 0x239   : > { %v1093_v63 = vpop.f32.mrb[50].mxu1  ;;  %3407 = vst [vmem:[#allocation31_spill] sm:$0xff] %v2859_v2  ;;  %v1190_v10 = vmax.f32 %v1188_v56, %v2841_v14 }
 0x23a   : > { %v1095_v45 = vpop.f32.mrb[51].mxu1  ;;  %v2853_v62 = vadd.f32 %v1093_v63, %v2680_v36  ;;  %v1156_v46 = vmax.f32 %v1154_v5, %v2835_v8  ;;  %v2867_v63 = vadd.f32 %v1087_v15, %v2635_v12  ;;  %v1193_v53 = vmax.f32 %v1191_v7, %v2844_v43  ;;  %3409 = vst [vmem:[#allocation33_spill] sm:$0xff] %v2872_v4 }
 0x23b   : > { %v2862_v9 = vadd.f32 %v1095_v45, %v2680_v36  ;;  %v1155_v20 = vmax.f32 %v1153_v54, %v2850_v42  ;;  %v1192_v15 = vmax.f32 %v1190_v10, %v2859_v2  ;;  %v694_v54 = vpop.permute.xlu1 %693 }
 0x23c   : > { %3408 = vst [vmem:[#allocation32_spill] sm:$0xff] %v2867_v63  ;;  %v1158_v36 = vmax.f32 %v1156_v46, %v2853_v62 }
 0x23d   : > { %v1099_v16 = vpop.f32.mrb[52].mxu1  ;;  %v1195_v21 = vmax.f32 %v1193_v53, %v2862_v9  ;;  %v1157_v31 = vmax.f32 %v1155_v20, %v2867_v63 }
 0x23e   : > { %v1101_v17 = vpop.f32.mrb[53].mxu1  ;;  %v2877_v45 = vadd.f32 %v1099_v16, %v2738_v49  ;;  %v1194_v16 = vmax.f32 %v1192_v15, %v2872_v4 }
 0x23f   : > { %v2884_v56 = vadd.f32 %v1101_v17, %v2738_v49  ;;  %v699_v4 = vpop.permute.xlu1 %698 }
 0x240   : > { %v1159_v43 = vmax.f32 %v1157_v31, %v2877_v45 }
 0x241   : > { %v1105_v6 = vpop.f32.mrb[54].mxu1  ;;  %v1196_v49 = vmax.f32 %v1194_v16, %v2884_v56 }
 0x242   : > { %v2879_v34 = vadd.f32 %v1105_v6, %v684_v29  ;;  %v1107_v5 = vpop.f32.mrb[55].mxu1 }
 0x243   : > { %v2886_v12 = vadd.f32 %v1107_v5, %v684_v29 }
 0x244   : > { %v1160_v7 = vmax.f32 %v1158_v36, %v2879_v34 }
 0x245   : > { %v1197_v6 = vmax.f32 %v1195_v21, %v2886_v12  ;;  %v1111_v46 = vpop.f32.mrb[56].mxu1 }
 0x246   : > { %v2893_v10 = vadd.f32 %v1111_v46, %v689_v19  ;;  %v1113_v53 = vpop.f32.mrb[57].mxu1 }
 0x247   : > { %v2896_v17 = vadd.f32 %v1113_v53, %v689_v19  ;;  %v704_v53 = vpop.permute.xlu1 %703 }
 0x248   : > { %v1161_v29 = vmax.f32 %v1159_v43, %v2893_v10 }
 0x249   : > { %v1198_v20 = vmax.f32 %v1196_v49, %v2896_v17  ;;  %v1117_v36 = vpop.f32.mrb[58].mxu1 }
 0x24a   : > { %v2900_v5 = vadd.f32 %v1117_v36, %v694_v54  ;;  %v1119_v15 = vpop.f32.mrb[59].mxu1 }
 0x24b   : > { %v2902_v21 = vadd.f32 %v1119_v15, %v694_v54 }
 0x24c   : > { %v1162_v31 = vmax.f32 %v1160_v7, %v2900_v5 }
 0x24d   : > { %v1199_v46 = vmax.f32 %v1197_v6, %v2902_v21  ;;  %v1123_v63 = vpop.f32.mrb[60].mxu1 }
 0x24e   : > { %v2906_v8 = vadd.f32 %v1123_v63, %v699_v4  ;;  %v1125_v19 = vpop.f32.mrb[61].mxu1 }
 0x24f   : > { %v2908_v16 = vadd.f32 %v1125_v19, %v699_v4 }
 0x250   : > { %v1163_v43 = vmax.f32 %v1161_v29, %v2906_v8  ;;  %v2296_v29 = vmov 1966171168  }
 0x251   : > { %v1200_v49 = vmax.f32 %v1198_v20, %v2908_v16  ;;  %v1129_v36 = vpop.f32.mrb[62].mxu1  ;;  %v1213_v28 = vunpack.c.l.s4 %v2296_v29 }
 0x252   : > { %v2912_v2 = vadd.f32 %v1129_v36, %v704_v53  ;;  %v1131_v54 = vpop.f32.mrb[63].mxu1 }
 0x253   : > { %v2914_v15 = vadd.f32 %v1131_v54, %v704_v53  ;;  %v1214_v1 = vunpack.c.0.s8 %v1213_v28  ;;  %v3410_v53 = vlaneseq  ;;  %v506_v28 = vld [vmem:[%s2927_s16 + $0x8] sm:$0xff] }
 0x254   : > { %v1164_v7 = vmax.f32 %v1162_v31, %v2912_v2  ;;  %1599 = vmatprep.mubr.f32.mxu0 %v506_v28 }
 0x255   : > { %v1201_v6 = vmax.f32 %v1199_v46, %v2914_v15  ;;  %v1216_v54 = vshrl.u32 %v3410_v53, 7  ;;  %v3413_v53 = vld [vmem:[#allocation19_spill] sm:$0xff] }
 0x256   : > { %v1165_v63 = vmax.f32 %v1163_v43, %v1164_v7 }
 0x257   : > { %v1202_v42 = vmax.f32 %v1200_v49, %v1201_v6  ;;  %v2919_v43 = vsub.s32 %v1214_v1, %v1216_v54 }
 0x258   : > { %v1166_v37 = vrot.slane %v1165_v63, 4 }
 0x259   : > { %v1203_v4 = vrot.slane %v1202_v42, 4 }
 0x25a   : > { %v1167_v19 = vmax.f32 %v1165_v63, %v1166_v37 }
 0x25b   : > { %v1204_v14 = vmax.f32 %v1202_v42, %v1203_v4  ;;  %v2943_v42 = vsub.s32 1, %v1216_v54 }
 0x25c   : > { %v1168_v20 = vrot.slane %v1167_v19, 2 }
 0x25d   : > { %v1205_v39 = vrot.slane %v1204_v14, 2  ;;  %3412 = vst [vmem:[#allocation10_spill] sm:$0xff] %v2943_v42 }
 0x25e   : > { %v1169_v36 = vmax.f32 %v1167_v19, %v1168_v20 }
 0x25f   : > { %v1206_v0 = vmax.f32 %v1204_v14, %v1205_v39  ;;  %v2929_v14 = vld [vmem:[#allocation3] sm:$0x3] }
 0x260   : > { %v1170_v11 = vrot.slane %v1169_v36, 1 }
 0x261   : > { %v1207_v31 = vrot.slane %v1206_v0, 1 }
 0x262   : > { %v1171_v18 = vmax.f32 %v1169_v36, %v1170_v11 }
 0x263   : > { %v1208_v46 = vmax.f32 %v1206_v0, %v1207_v31  ;;  %v2941_v0 = vsub.s32 0, %v1216_v54 }
 0x265   : > { %v1211_v49 = vcombine.low %v1171_v18, %v1208_v46 }
 0x267   : > { %v1218_v37 = vrot.slane %v1211_v49, %v2919_v43 }
 0x269   : > { %v1225_v39 = vrot.slane %v1218_v37, %v2919_v43 }
 0x26b   : > { %v2934_v11 = vmax.f32 %v2929_v14, %v1225_v39 }
 0x26d   : > { %1534 = vst.msk [vmem:[#allocation3] sm:$0x3] %vm2556_vm3, %v2934_v11  ;;  %v2947_v7 = vrot.slane %v2934_v11, %v2941_v0  ;;  %v2951_v6 = vrot.slane %v2934_v11, %v2943_v42 }
 0x26f   : > { %v1242_v63 = vsub.f32 %v2670_v35, %v2947_v7  ;;  %v1243_v4 = vsub.f32 %v2684_v24, %v2951_v6  ;;  %v1244_v19 = vsub.f32 %v2647_v44, %v2947_v7  ;;  %v1245_v29 = vsub.f32 %v2659_v41, %v2951_v6  ;;  %v3415_v44 = vld [vmem:[#allocation21_spill] sm:$0xff]  ;;  %v3424_v24 = vld [vmem:[#allocation27_spill] sm:$0xff] }
 0x270   : > { %v1246_v20 = vsub.f32 %v2650_v30, %v2947_v7  ;;  %v1247_v36 = vsub.f32 %v2663_v25, %v2951_v6  ;;  %v1248_v54 = vsub.f32 %v3413_v53, %v2947_v7  ;;  %v3414_v25 = vld [vmem:[#allocation20_spill] sm:$0xff]  ;;  %v1250_v37 = vsub.f32 %v2675_v48, %v2947_v7 }
 0x271   : > { %v1306_v31 = vmul.f32 1.442695, %v1242_v63  ;;  %v1308_v46 = vmul.f32 1.442695, %v1243_v4  ;;  %v1249_v49 = vsub.f32 %v3414_v25, %v2951_v6  ;;  %v1310_v30 = vmul.f32 1.442695, %v1244_v19 }
 0x272   : > { %v1312_v41 = vmul.f32 1.442695, %v1245_v29  ;;  %v1314_v28 = vmul.f32 1.442695, %v1246_v20  ;;  %v1251_v39 = vsub.f32 %v2690_v32, %v2951_v6  ;;  %v1316_v53 = vmul.f32 1.442695, %v1247_v36 }
 0x273   : > { %2081 = vpow2.f32 %v1306_v31  ;;  %v1252_v18 = vsub.f32 %v3415_v44, %v2947_v7  ;;  %v1318_v63 = vmul.f32 1.442695, %v1248_v54  ;;  %v3416_v4 = vld [vmem:[#allocation22_spill] sm:$0xff]  ;;  %v1320_v19 = vmul.f32 1.442695, %v1249_v49 }
 0x274   : > { %2083 = vpow2.f32 %v1308_v46  ;;  %v1253_v25 = vsub.f32 %v3416_v4, %v2951_v6  ;;  %v1254_v48 = vsub.f32 %v2702_v22, %v2947_v7  ;;  %v1322_v29 = vmul.f32 1.442695, %v1250_v37 }
 0x275   : > { %2085 = vpow2.f32 %v1310_v30  ;;  %v1255_v32 = vsub.f32 %v2714_v47, %v2951_v6  ;;  %v1324_v20 = vmul.f32 1.442695, %v1251_v39  ;;  %v1256_v36 = vsub.f32 %v2678_v23, %v2947_v7 }
 0x276   : > { %2087 = vpow2.f32 %v1312_v41  ;;  %v1326_v54 = vmul.f32 1.442695, %v1252_v18  ;;  %v1257_v44 = vsub.f32 %v2693_v38, %v2951_v6  ;;  %v1258_v41 = vsub.f32 %v2577_v57, %v2947_v7 }
 0x277   : > { %2089 = vpow2.f32 %v1314_v28  ;;  %v1328_v22 = vmul.f32 1.442695, %v1253_v25  ;;  %v1259_v30 = vsub.f32 %v2581_v59, %v2951_v6  ;;  %v1260_v47 = vsub.f32 %v2705_v33, %v2947_v7 }
 0x278   : > { %2091 = vpow2.f32 %v1316_v53  ;;  %v1330_v31 = vmul.f32 1.442695, %v1254_v48  ;;  %v1261_v23 = vsub.f32 %v2717_v55, %v2951_v6  ;;  %v1262_v18 = vsub.f32 %v2733_v52, %v2947_v7  ;;  %v3417_v48 = vld [vmem:[#allocation23_spill] sm:$0xff] }
 0x279   : > { %2093 = vpow2.f32 %v1318_v63  ;;  %v1332_v38 = vmul.f32 1.442695, %v1255_v32  ;;  %v1263_v57 = vsub.f32 %v2744_v3, %v2951_v6  ;;  %v1264_v59 = vsub.f32 %v2722_v60, %v2947_v7 }
 0x27a   : > { %2095 = vpow2.f32 %v1320_v19  ;;  %v1334_v33 = vmul.f32 1.442695, %v1256_v36  ;;  %v1265_v37 = vsub.f32 %v2727_v27, %v2951_v6  ;;  %v1266_v55 = vsub.f32 %v2754_v51, %v2947_v7  ;;  %v3419_v36 = vld [vmem:[#allocation28_spill] sm:$0xff] }
 0x27b   : > { %2097 = vpow2.f32 %v1322_v29  ;;  %v1336_v52 = vmul.f32 1.442695, %v1257_v44  ;;  %v1267_v39 = vsub.f32 %v2764_v50, %v2951_v6  ;;  %v1268_v3 = vsub.f32 %v2736_v61, %v2947_v7 }
 0x27c   : > { %2099 = vpow2.f32 %v1324_v20  ;;  %v1338_v60 = vmul.f32 1.442695, %v1258_v41  ;;  %v1269_v63 = vsub.f32 %v2748_v26, %v2951_v6  ;;  %v1270_v27 = vsub.f32 %v2774_v13, %v2947_v7  ;;  %v3418_v26 = vld [vmem:[#allocation26_spill] sm:$0xff] }
 0x27d   : > { %v3023_v46 = vpop.eup %2081  ;;  %2101 = vpow2.f32 %v1326_v54  ;;  %v1340_v51 = vmul.f32 1.442695, %v1259_v30  ;;  %v1271_v25 = vsub.f32 %v2783_v58, %v2951_v6  ;;  %v1272_v50 = vsub.f32 %v2758_v40, %v2947_v7  ;;  %v3420_v58 = vld [vmem:[#allocation24_spill] sm:$0xff] }
 0x27e   : > { %v2084_v49 = vpop.eup %2083  ;;  %2103 = vpow2.f32 %v1328_v22  ;;  %v1342_v61 = vmul.f32 1.442695, %v1260_v47  ;;  %v1344_v13 = vmul.f32 1.442695, %v1261_v23  ;;  %v1346_v40 = vmul.f32 1.442695, %v1262_v18 }
 0x27f   : > { %v2086_v28 = vpop.eup %2085  ;;  %2105 = vpow2.f32 %v1330_v31  ;;  %v3421_v22 = vld [vmem:[#allocation25_spill] sm:$0xff]  ;;  %v3422_v47 = vld [vmem:[#allocation14_spill] sm:$0xff]  ;;  %v1352_v44 = vmul.f32 1.442695, %v1265_v37  ;;  %v1354_v54 = vmul.f32 1.442695, %v1266_v55 }
 0x280   : > { %v2088_v53 = vpop.eup %2087  ;;  %2107 = vpow2.f32 %v1332_v38  ;;  %v1348_v38 = vmul.f32 1.442695, %v1263_v57  ;;  %v1436_v30 = vadd.f32 %v2086_v28, %v3023_v46  ;;  %v1955_v31 = vpack.c.bf16 %v2086_v28, %v3023_v46 }
 0x281   : > { %v3041_v4 = vpop.eup %2089  ;;  %2109 = vpow2.f32 %v1334_v33  ;;  %v3423_v33 = vld [vmem:[#allocation15_spill] sm:$0xff]  ;;  %v1473_v57 = vadd.f32 %v2088_v53, %v2084_v49  ;;  %v1358_v37 = vmul.f32 1.442695, %v1268_v3  ;;  %v1360_v46 = vmul.f32 1.442695, %v1269_v63 }
 0x282   : > { %v2092_v19 = vpop.eup %2091  ;;  %2111 = vpow2.f32 %v1336_v52  ;;  %v3425_v52 = vld [vmem:[#allocation29_spill] sm:$0xff] }
 0x283   : > { %v3051_v20 = vpop.eup %2093  ;;  %2113 = vpow2.f32 %v1338_v60  ;;  %v1350_v60 = vmul.f32 1.442695, %v1264_v59  ;;  %v1437_v59 = vadd.f32 %v3041_v4, %v1436_v30  ;;  %v1474_v55 = vadd.f32 %v2092_v19, %v1473_v57 }
 0x284   : > { %v2096_v41 = vpop.eup %2095  ;;  %2115 = vpow2.f32 %v1340_v51  ;;  %v1953_v51 = vpack.c.bf16 %v2088_v53, %v2084_v49  ;;  %v3426_v49 = vld [vmem:[#allocation11_spill] sm:$0xff]  ;;  %v1959_v63 = vpack.c.bf16 %v3051_v20, %v3041_v4  ;;  %v3430_v4 = vld [vmem:[#allocation30_spill] sm:$0xff] }
 0x285   : > { %v3061_v23 = vpop.eup %2097  ;;  %2117 = vpow2.f32 %v1342_v61  ;;  %v1356_v61 = vmul.f32 1.442695, %v1267_v39  ;;  %v1957_v35 = vpack.c.bf16 %v2096_v41, %v2092_v19  ;;  %v1438_v28 = vadd.f32 %v3051_v20, %v1437_v59  ;;  %v3427_v39 = vld [vmem:[#allocation16_spill] sm:$0xff] }
 0x286   : > { %v2100_v18 = vpop.eup %2099  ;;  %2119 = vpow2.f32 %v1344_v13  ;;  %1954 = vmatprep.subr.bf16.mxu0 %v1953_v51  ;;  %v1283_v30 = vsub.f32 %v3427_v39, %v2951_v6  ;;  %v1475_v3 = vadd.f32 %v2096_v41, %v1474_v55  ;;  %v1364_v19 = vmul.f32 1.442695, %v1271_v25 }
 0x287   : > { %v3068_v32 = vpop.eup %2101  ;;  %2121 = vpow2.f32 %v1346_v40  ;;  %1956 = vmatpush1.bf16.msra.mxu0 %v1955_v31  ;;  %v1439_v51 = vadd.f32 %v3061_v23, %v1438_v28  ;;  %v1366_v31 = vmul.f32 1.442695, %v1272_v50  ;;  %v1285_v20 = vsub.f32 %v3430_v4, %v2951_v6 }
 0x288   : > { %v2104_v29 = vpop.eup %2103  ;;  %2123 = vpow2.f32 %v1348_v38  ;;  %1958 = vmatprep.subr.bf16.mxu0 %v1957_v35  ;;  %v1476_v59 = vadd.f32 %v2100_v18, %v1475_v3  ;;  %v3429_v35 = vsub.f32 %v3417_v48, %v2951_v6  ;;  %v3431_v50 = vsub.f32 %v3418_v26, %v2947_v7 }
 0x289   : > { %v3074_v13 = vpop.eup %2105  ;;  %2125 = vpow2.f32 %v1350_v60  ;;  %v1362_v60 = vmul.f32 1.442695, %v1270_v27  ;;  %v1961_v53 = vpack.c.bf16 %v2104_v29, %v2100_v18  ;;  %v1440_v41 = vadd.f32 %v3068_v32, %v1439_v51 }
 0x28a   : > { %v2108_v40 = vpop.eup %2107  ;;  %2127 = vpow2.f32 %v1352_v44  ;;  %v1368_v25 = vmul.f32 1.442695, %v3429_v35  ;;  %v1370_v18 = vmul.f32 1.442695, %v3431_v50  ;;  %v3432_v48 = vsub.f32 %v3419_v36, %v2951_v6 }
 0x28b   : > { %v3079_v38 = vpop.eup %2109  ;;  %2129 = vpow2.f32 %v1354_v54  ;;  %v3428_v54 = vld [vmem:[#allocation12_spill] sm:$0xff]  ;;  %1960 = vmatpush1.bf16.msra.mxu0 %v1959_v63  ;;  %v1441_v28 = vadd.f32 %v3074_v13, %v1440_v41  ;;  %v1963_v3 = vpack.c.bf16 %v3068_v32, %v3061_v23  ;;  %v3433_v26 = vsub.f32 %v3420_v58, %v2947_v7 }
 0x28c   : > { %v2112_v57 = vpop.eup %2111  ;;  %2131 = vpow2.f32 %v1356_v61  ;;  %v1284_v27 = vsub.f32 %v3428_v54, %v2947_v7  ;;  %1962 = vmatprep.subr.bf16.mxu0 %v1961_v53  ;;  %v3435_v36 = vsub.f32 %v3421_v22, %v2951_v6  ;;  %v3438_v22 = vsub.f32 %v3423_v33, %v2951_v6 }
 0x28d   : > { %v3086_v44 = vpop.eup %2113  ;;  %2133 = vpow2.f32 %v1358_v37  ;;  %v1477_v37 = vadd.f32 %v2104_v29, %v1476_v59  ;;  %v1965_v53 = vpack.c.bf16 %v2112_v57, %v2108_v40  ;;  %v1442_v32 = vadd.f32 %v3079_v38, %v1441_v28 }
 0x28e   : > { %v2116_v42 = vpop.eup %2115  ;;  %2135 = vpow2.f32 %v1360_v46  ;;  %v1372_v46 = vmul.f32 1.442695, %v3432_v48  ;;  %v1376_v54 = vmul.f32 1.442695, %v3435_v36  ;;  %v1380_v4 = vmul.f32 1.442695, %v3438_v22 }
 0x28f   : > { %v3094_v61 = vpop.eup %2117  ;;  %2137 = vpow2.f32 %v1362_v60  ;;  %v1374_v60 = vmul.f32 1.442695, %v3433_v26  ;;  %v1478_v29 = vadd.f32 %v2108_v40, %v1477_v37  ;;  %1964 = vmatpush1.bf16.msra.mxu0 %v1963_v3  ;;  %v3437_v40 = vsub.f32 %v3422_v47, %v2947_v7 }
 0x290   : > { %v2120_v55 = vpop.eup %2119  ;;  %2139 = vpow2.f32 %v1364_v19  ;;  %v3434_v19 = vld [vmem:[#allocation13_spill] sm:$0xff]  ;;  %1966 = vmatprep.subr.bf16.mxu0 %v1965_v53  ;;  %v1443_v50 = vadd.f32 %v3086_v44, %v1442_v32  ;;  %v1967_v37 = vpack.c.bf16 %v3079_v38, %v3074_v13  ;;  %v3439_v47 = vsub.f32 %v3424_v24, %v2947_v7 }
 0x291   : > { %v3107_v51 = vpop.eup %2121  ;;  %2141 = vpow2.f32 %v1366_v31  ;;  %v1286_v59 = vsub.f32 %v3434_v19, %v2947_v7  ;;  %v3436_v31 = vld [vmem:[#allocation31_spill] sm:$0xff]  ;;  %v1378_v35 = vmul.f32 1.442695, %v3437_v40  ;;  %v1479_v41 = vadd.f32 %v2112_v57, %v1478_v29 }
 0x292   : > { %v2124_v63 = vpop.eup %2123  ;;  %2143 = vpow2.f32 %v1368_v25  ;;  %v1287_v58 = vsub.f32 %v3436_v31, %v2951_v6  ;;  %v1969_v28 = vpack.c.bf16 %v2120_v55, %v2116_v42  ;;  %v3441_v33 = vsub.f32 %v3425_v52, %v2951_v6 }
 0x293   : > { %v3118_v23 = vpop.eup %2125  ;;  %2145 = vpow2.f32 %v1370_v18  ;;  %v1382_v18 = vmul.f32 1.442695, %v3439_v47  ;;  %v1480_v57 = vadd.f32 %v2116_v42, %v1479_v41  ;;  %v1444_v13 = vadd.f32 %v3094_v61, %v1443_v50  ;;  %1968 = vmatpush1.bf16.msra.mxu0 %v1967_v37  ;;  %v3445_v50 = vld [vmem:[#allocation33_spill] sm:$0xff] }
 0x294   : > { %v2128_v25 = vpop.eup %2127  ;;  %2147 = vpow2.f32 %v1372_v46  ;;  %v3440_v46 = vld [vmem:[#allocation17_spill] sm:$0xff]  ;;  %v1384_v29 = vmul.f32 1.442695, %v3441_v33  ;;  %v3443_v42 = vsub.f32 %v3426_v49, %v2947_v7  ;;  %1970 = vmatprep.subr.bf16.mxu0 %v1969_v28  ;;  %v1388_v52 = vmul.f32 1.442695, %v1283_v30 }
 0x295   : > { %v3131_v48 = vpop.eup %2129  ;;  %2149 = vpow2.f32 %v1374_v60  ;;  %v1288_v26 = vsub.f32 %v3440_v46, %v2947_v7  ;;  %v3442_v60 = vld [vmem:[#allocation18_spill] sm:$0xff]  ;;  %v1481_v19 = vadd.f32 %v2120_v55, %v1480_v57  ;;  %v1971_v32 = vpack.c.bf16 %v3094_v61, %v3086_v44  ;;  %v3444_v55 = vld [vmem:[#allocation32_spill] sm:$0xff] }
 0x296   : > { %v2132_v3 = vpop.eup %2131  ;;  %2151 = vpow2.f32 %v1376_v54  ;;  %v1289_v53 = vsub.f32 %v3442_v60, %v2951_v6  ;;  %v1386_v24 = vmul.f32 1.442695, %v3443_v42  ;;  %v1445_v54 = vadd.f32 %v3107_v51, %v1444_v13 }
 0x297   : > { %v2134_v38 = vpop.eup %2133  ;;  %2153 = vpow2.f32 %v1378_v35  ;;  %v1390_v40 = vmul.f32 1.442695, %v1284_v27  ;;  %v1482_v35 = vadd.f32 %v2124_v63, %v1481_v19  ;;  %v1973_v49 = vpack.c.bf16 %v2128_v25, %v2124_v63  ;;  %1972 = vmatpush1.bf16.msra.mxu0 %v1971_v32 }
 0x298   : > { %v2136_v36 = vpop.eup %2135  ;;  %2155 = vpow2.f32 %v1380_v4  ;;  %v1290_v22 = vsub.f32 %v3444_v55, %v2947_v7  ;;  %v1392_v4 = vmul.f32 1.442695, %v1285_v20  ;;  %v1446_v39 = vadd.f32 %v3118_v23, %v1445_v54 }
 0x299   : > { %v3153_v31 = vpop.eup %2137  ;;  %2157 = vpow2.f32 %v1382_v18  ;;  %v1291_v37 = vsub.f32 %v3445_v50, %v2951_v6  ;;  %v1394_v44 = vmul.f32 1.442695, %v1286_v59  ;;  %v1483_v61 = vadd.f32 %v2128_v25, %v1482_v35  ;;  %1974 = vmatprep.subr.bf16.mxu0 %v1973_v49 }
 0x29a   : > { %v2140_v41 = vpop.eup %2139  ;;  %2159 = vpow2.f32 %v1384_v29  ;;  %v1396_v63 = vmul.f32 1.442695, %v1287_v58  ;;  %v1447_v47 = vadd.f32 %v3131_v48, %v1446_v39  ;;  %v1975_v18 = vpack.c.bf16 %v3118_v23, %v3107_v51 }
 0x29b   : > { %v2142_v30 = vpop.eup %2141  ;;  %2161 = vpow2.f32 %v1386_v24  ;;  %v1398_v57 = vmul.f32 1.442695, %v1288_v26  ;;  %v1484_v28 = vadd.f32 %v2132_v3, %v1483_v61  ;;  %v1977_v46 = vpack.c.bf16 %v2136_v36, %v2132_v3 }
 0x29c   : > { %v2144_v27 = vpop.eup %2143  ;;  %2163 = vpow2.f32 %v1388_v52  ;;  %v1400_v29 = vmul.f32 1.442695, %v1289_v53  ;;  %v1448_v59 = vadd.f32 %v2134_v38, %v1447_v47  ;;  %1976 = vmatpush1.bf16.msra.mxu0 %v1975_v18  ;;  %v1402_v13 = vmul.f32 1.442695, %v1290_v22 }
 0x29d   : > { %v3163_v20 = vpop.eup %2145  ;;  %2165 = vpow2.f32 %v1390_v40  ;;  %v1485_v58 = vadd.f32 %v2136_v36, %v1484_v28  ;;  %1978 = vmatprep.subr.bf16.mxu0 %v1977_v46  ;;  %v1404_v42 = vmul.f32 1.442695, %v1291_v37  ;;  %v1979_v23 = vpack.c.bf16 %v2134_v38, %v3131_v48 }
 0x29e   : > { %v2148_v33 = vpop.eup %2147  ;;  %2167 = vpow2.f32 %v1392_v4  ;;  %v1449_v51 = vadd.f32 %v3153_v31, %v1448_v59  ;;  %v3446_v3 = vsub.f32 %v2853_v62, %v2947_v7  ;;  %v1981_v19 = vpack.c.bf16 %v2144_v27, %v2140_v41 }
 0x29f   : > { %v2150_v25 = vpop.eup %2149  ;;  %2169 = vpow2.f32 %v1394_v44  ;;  %v1486_v24 = vadd.f32 %v2140_v41, %v1485_v58  ;;  %v3447_v36 = vsub.f32 %v2862_v9, %v2951_v6  ;;  %v3448_v48 = vsub.f32 %v2877_v45, %v2947_v7 }
 0x2a0   : > { %v2152_v60 = vpop.eup %2151  ;;  %2171 = vpow2.f32 %v1396_v63  ;;  %v1406_v53 = vmul.f32 1.442695, %v3446_v3  ;;  %v1450_v32 = vadd.f32 %v2142_v30, %v1449_v51  ;;  %1980 = vmatpush1.bf16.msra.mxu0 %v1979_v23  ;;  %v3449_v49 = vsub.f32 %v2884_v56, %v2951_v6 }
 0x2a1   : > { %v3167_v26 = vpop.eup %2153  ;;  %2173 = vpow2.f32 %v1398_v57  ;;  %v1408_v54 = vmul.f32 1.442695, %v3447_v36  ;;  %v1410_v38 = vmul.f32 1.442695, %v3448_v48  ;;  %v1487_v35 = vadd.f32 %v2144_v27, %v1486_v24  ;;  %1982 = vmatprep.subr.bf16.mxu0 %v1981_v19 }
 0x2a2   : > { %v2156_v52 = vpop.eup %2155  ;;  %2175 = vpow2.f32 %v1400_v29  ;;  %v1412_v41 = vmul.f32 1.442695, %v3449_v49  ;;  %v1451_v55 = vadd.f32 %v3163_v20, %v1450_v32  ;;  %v1983_v9 = vpack.c.bf16 %v2142_v30, %v3153_v31 }
 0x2a3   : > { %v2158_v40 = vpop.eup %2157  ;;  %2177 = vpow2.f32 %v1402_v13  ;;  %v3450_v4 = vsub.f32 %v2879_v34, %v2947_v7  ;;  %v1488_v39 = vadd.f32 %v2148_v33, %v1487_v35  ;;  %v1985_v50 = vpack.c.bf16 %v2152_v60, %v2148_v33 }
 0x2a4   : > { %v2160_v62 = vpop.eup %2159  ;;  %2179 = vpow2.f32 %v1404_v42  ;;  %v3451_v44 = vsub.f32 %v2886_v12, %v2951_v6  ;;  %v1452_v61 = vadd.f32 %v2150_v25, %v1451_v55  ;;  %1984 = vmatpush1.bf16.msra.mxu0 %v1983_v9  ;;  %v3452_v31 = vsub.f32 %v2893_v10, %v2947_v7 }
 0x2a5   : > { %v3183_v22 = vpop.eup %2161  ;;  %2181 = vpow2.f32 %v1406_v53  ;;  %v1414_v45 = vmul.f32 1.442695, %v3450_v4  ;;  %v1489_v63 = vadd.f32 %v2152_v60, %v1488_v39  ;;  %1986 = vmatprep.subr.bf16.mxu0 %v1985_v50  ;;  %v3453_v47 = vsub.f32 %v2896_v17, %v2951_v6 }
 0x2a6   : > { %v2164_v37 = vpop.eup %2163  ;;  %2183 = vpow2.f32 %v1408_v54  ;;  %v1416_v56 = vmul.f32 1.442695, %v3451_v44  ;;  %v1418_v30 = vmul.f32 1.442695, %v3452_v31  ;;  %v1453_v57 = vadd.f32 %v3167_v26, %v1452_v61 }
 0x2a7   : > { %v2166_v27 = vpop.eup %2165  ;;  %2185 = vpow2.f32 %v1410_v38  ;;  %v1420_v18 = vmul.f32 1.442695, %v3453_v47  ;;  %v1987_v12 = vpack.c.bf16 %v2150_v25, %v3163_v20  ;;  %v3454_v46 = vsub.f32 %v2900_v5, %v2947_v7 }
 0x2a8   : > { %v2168_v34 = vpop.eup %2167  ;;  %2187 = vpow2.f32 %v1412_v41  ;;  %v1490_v10 = vadd.f32 %v2156_v52, %v1489_v63  ;;  %v1989_v29 = vpack.c.bf16 %v2160_v62, %v2156_v52  ;;  %v3455_v13 = vsub.f32 %v2902_v21, %v2951_v6 }
 0x2a9   : > { %v2170_v28 = vpop.eup %2169  ;;  %2189 = vpow2.f32 %v1414_v45  ;;  %v1422_v33 = vmul.f32 1.442695, %v3454_v46  ;;  %v1454_v17 = vadd.f32 %v2158_v40, %v1453_v57  ;;  %1988 = vmatpush1.bf16.msra.mxu0 %v1987_v12  ;;  %v3456_v20 = vsub.f32 %v2906_v8, %v2947_v7 }
 0x2aa   : > { %v2172_v59 = vpop.eup %2171  ;;  %2191 = vpow2.f32 %v1416_v56  ;;  %v1424_v58 = vmul.f32 1.442695, %v3455_v13  ;;  %v1491_v42 = vadd.f32 %v2160_v62, %v1490_v10  ;;  %1990 = vmatprep.subr.bf16.mxu0 %v1989_v29  ;;  %v3457_v51 = vsub.f32 %v2908_v16, %v2951_v6 }
 0x2ab   : > { %v2174_v60 = vpop.eup %2173  ;;  %2193 = vpow2.f32 %v1418_v30  ;;  %v1426_v25 = vmul.f32 1.442695, %v3456_v20  ;;  %v1455_v3 = vadd.f32 %v3183_v22, %v1454_v17  ;;  %v1991_v21 = vpack.c.bf16 %v2158_v40, %v3167_v26 }
 0x2ac   : > { %v2176_v5 = vpop.eup %2175  ;;  %2195 = vpow2.f32 %v1420_v18  ;;  %v1428_v23 = vmul.f32 1.442695, %v3457_v51  ;;  %v3458_v24 = vsub.f32 %v2912_v2, %v2947_v7  ;;  %v1492_v8 = vadd.f32 %v2164_v37, %v1491_v42 }
 0x2ad   : > { %v2178_v53 = vpop.eup %2177  ;;  %2197 = vpow2.f32 %v1422_v33  ;;  %v1993_v52 = vpack.c.bf16 %v2168_v34, %v2164_v37  ;;  %v3459_v54 = vsub.f32 %v2914_v15, %v2951_v6  ;;  %v1456_v16 = vadd.f32 %v2166_v27, %v1455_v3  ;;  %1992 = vmatpush1.bf16.msra.mxu0 %v1991_v21 }
 0x2ae   : > { %v1430_v19 = vmul.f32 1.442695, %v3458_v24  ;;  %v2180_v36 = vpop.eup %2179  ;;  %2199 = vpow2.f32 %v1424_v58  ;;  %v1493_v38 = vadd.f32 %v2168_v34, %v1492_v8  ;;  %v1995_v2 = vpack.c.bf16 %v2166_v27, %v3183_v22  ;;  %v505_v24 = vld [vmem:[%s2927_s16] sm:$0xff]  ;;  %v508_v8 = vld [vmem:[%s2927_s16 + $0x18] sm:$0xff] }
 0x2af   : > { %v1432_v32 = vmul.f32 1.442695, %v3459_v54  ;;  %v2182_v48 = vpop.eup %2181  ;;  %2201 = vpow2.f32 %v1426_v25  ;;  %1994 = vmatprep.subr.bf16.mxu0 %v1993_v52  ;;  %v1457_v40 = vadd.f32 %v2170_v28, %v1456_v16  ;;  %v1997_v49 = vpack.c.bf16 %v2176_v5, %v2172_v59 }
 0x2b0   : > { %v2184_v26 = vpop.eup %2183  ;;  %2203 = vpow2.f32 %v1428_v23  ;;  %v2003_v7 = vpack.c.bf16 %v2182_v48, %v2178_v53  ;;  %v1494_v62 = vadd.f32 %v2172_v59, %v1493_v38  ;;  %v1999_v39 = vpack.c.bf16 %v2174_v60, %v2170_v28 }
 0x2b1   : > { %v2186_v35 = vpop.eup %2185  ;;  %2205 = vpow2.f32 %v1430_v19  ;;  %v2001_v41 = vpack.c.bf16 %v2184_v26, %v2180_v36  ;;  %v1458_v15 = vadd.f32 %v2174_v60, %v1457_v40  ;;  %1996 = vmatpush1.bf16.msra.mxu0 %v1995_v2  ;;  %v3460_v51 = vsub.f32 %v2929_v14, %v2934_v11  ;;  %v510_v11 = vld [vmem:[%s2927_s16 + $0x28] sm:$0xff]  ;;  %v512_v2 = vld [vmem:[%s2927_s16 + $0x38] sm:$0xff] }
 0x2b2   : > { %v2188_v55 = vpop.eup %2187  ;;  %2207 = vpow2.f32 %v1432_v32  ;;  %v1495_v9 = vadd.f32 %v2176_v5, %v1494_v62  ;;  %1998 = vmatprep.subr.bf16.mxu0 %v1997_v49  ;;  %v507_v32 = vld [vmem:[%s2927_s16 + $0x10] sm:$0xff]  ;;  %v1434_v62 = vld [vmem:[#allocation4] sm:$0x3] }
 0x2b3   : > { %v2190_v6 = vpop.eup %2189  ;;  %v1459_v45 = vadd.f32 %v2178_v53, %v1458_v15  ;;  %v1229_v23 = vmul.f32 1.442695, %v3460_v51  ;;  %v511_v49 = vld [vmem:[%s2927_s16 + $0x30] sm:$0xff] }
 0x2b4   : > { %v2192_v4 = vpop.eup %2191  ;;  %v2007_v50 = vpack.c.bf16 %v2190_v6, %v2186_v35  ;;  %v1496_v44 = vadd.f32 %v2180_v36, %v1495_v9 }
 0x2b5   : > { %v2194_v37 = vpop.eup %2193  ;;  %v2005_v22 = vpack.c.bf16 %v2192_v4, %v2188_v55  ;;  %v1460_v61 = vadd.f32 %v2182_v48, %v1459_v45  ;;  %2000 = vmatpush1.bf16.msra.mxu0 %v1999_v39  ;;  %2209 = vpow2.f32 %v1229_v23  ;;  %v3461_v45 = vld [vmem:[#allocation10_spill] sm:$0xff] }
 0x2b6   : > { %v2196_v56 = vpop.eup %2195  ;;  %v1497_v31 = vadd.f32 %v2184_v26, %v1496_v44  ;;  %2002 = vmatprep.subr.bf16.mxu0 %v2001_v41  ;;  %v509_v26 = vld [vmem:[%s2927_s16 + $0x20] sm:$0xff] }
 0x2b7   : > { %v2198_v27 = vpop.eup %2197  ;;  %v1461_v63 = vadd.f32 %v2186_v35, %v1460_v61  ;;  %v1700_v61 = vstv %s1699_s12 }
 0x2b8   : > { %v2200_v30 = vpop.eup %2199  ;;  %v2011_v34 = vpack.c.bf16 %v2198_v27, %v2194_v37  ;;  %v1498_v18 = vadd.f32 %v2188_v55, %v1497_v31 }
 0x2b9   : > { %v2202_v47 = vpop.eup %2201  ;;  %v2009_v57 = vpack.c.bf16 %v2200_v30, %v2196_v56  ;;  %v1462_v46 = vadd.f32 %v2190_v6, %v1461_v63  ;;  %2004 = vmatpush1.bf16.msra.mxu0 %v2003_v7  ;;  %v1709_v63 = vld [vmem:[%s2406_s17] sm:$0xff] }
 0x2ba   : > { %v2204_v12 = vpop.eup %2203  ;;  %v1499_v33 = vadd.f32 %v2192_v4, %v1498_v18  ;;  %2006 = vmatprep.subr.bf16.mxu0 %v2005_v22 }
 0x2bb   : > { %v2206_v28 = vpop.eup %2205  ;;  %v1463_v29 = vadd.f32 %v2194_v37, %v1462_v46 }
 0x2bc   : > { %v2208_v10 = vpop.eup %2207  ;;  %v2015_v59 = vpack.c.bf16 %v2206_v28, %v2202_v47  ;;  %v1500_v13 = vadd.f32 %v2196_v56, %v1499_v33 }
 0x2bd   : > { %v2013_v58 = vpack.c.bf16 %v2208_v10, %v2204_v12  ;;  %v1464_v17 = vadd.f32 %v2198_v27, %v1463_v29  ;;  %2008 = vmatpush1.bf16.msra.mxu0 %v2007_v50 }
 0x2be   : > { %v1501_v60 = vadd.f32 %v2200_v30, %v1500_v13  ;;  %2010 = vmatprep.subr.bf16.mxu0 %v2009_v57  ;;  %v1710_v57 = vld [vmem:[%s2406_s17 + $0x8] sm:$0xff] }
 0x2bf   : > { %v1465_v20 = vadd.f32 %v2202_v47, %v1464_v17  ;;  %v2210_v35 = vpop.eup %2209 }
 0x2c0   : > { %v1502_v25 = vadd.f32 %v2204_v12, %v1501_v60  ;;  %v1435_v55 = vmul.f32 %v2210_v35, %v1434_v62  ;;  %v1636_v4 = vrot.slane %v2210_v35, %v2941_v0  ;;  %v1640_v39 = vrot.slane %v2210_v35, %v3461_v45  ;;  %v1712_v60 = vld [vmem:[%s2406_s17 + $0x18] sm:$0xff] }
 0x2c1   : > { %v1466_v42 = vadd.f32 %v2206_v28, %v1465_v20  ;;  %2012 = vmatpush1.bf16.msra.mxu0 %v2011_v34 }
 0x2c2   : > { %v1503_v5 = vadd.f32 %v2208_v10, %v1502_v25  ;;  %2014 = vmatprep.subr.bf16.mxu0 %v2013_v58  ;;  %v1643_v37 = vmul.f32 0.0, %v1636_v4 }
 0x2c3   : > { %v1467_v3 = vrot.slane %v1466_v42, 4 }
 0x2c4   : > { %v1504_v21 = vrot.slane %v1503_v5, 4 }
 0x2c5   : > { %v1468_v53 = vadd.f32 %v1467_v3, %v1466_v42  ;;  %2016 = vmatpush1.bf16.msra.mxu0 %v2015_v59  ;;  %v1711_v59 = vld [vmem:[%s2406_s17 + $0x10] sm:$0xff] }
 0x2c6   : > { %v1505_v19 = vadd.f32 %v1504_v21, %v1503_v5  ;;  %v1713_v21 = vld [vmem:[%s2406_s17 + $0x20] sm:$0xff] }
 0x2c7   : > { %v1469_v52 = vrot.slane %v1468_v53, 2 }
 0x2c8   : > { %v1506_v36 = vrot.slane %v1505_v19, 2  ;;  %1600 = vmatmul.mubr.f32.vlgmr.msra.gmra.mrb[2].mxu0 %v505_v24 }
 0x2c9   : > { %v1470_v54 = vadd.f32 %v1469_v52, %v1468_v53  ;;  %1605 = vmatprep.mubr.f32.mxu0 %v508_v8  ;;  %v1714_v8 = vld [vmem:[%s2406_s17 + $0x28] sm:$0xff] }
 0x2ca   : > { %v1507_v14 = vadd.f32 %v1506_v36, %v1505_v19 }
 0x2cb   : > { %v1471_v16 = vrot.slane %v1470_v54, 1 }
 0x2cc   : > { %v1508_v48 = vrot.slane %v1507_v14, 1  ;;  %1606 = vmatmul.mubr.f32.gmra.mrb[4].mxu0 %v507_v32 }
 0x2cd   : > { %v1472_v38 = vadd.f32 %v1471_v16, %v1470_v54  ;;  %1611 = vmatprep.mubr.f32.mxu0 %v510_v11 }
 0x2ce   : > { %v1509_v40 = vadd.f32 %v1508_v48, %v1507_v14  ;;  %v1715_v48 = vld [vmem:[%s2406_s17 + $0x30] sm:$0xff] }
 0x2d0   : > { %v1512_v7 = vcombine.low %v1472_v38, %v1509_v40  ;;  %1612 = vmatmul.mubr.f32.gmra.mrb[6].mxu0 %v509_v26  ;;  %v1716_v40 = vld [vmem:[%s2406_s17 + $0x38] sm:$0xff]  ;;  %s2213_s17 = scalar_lea.vmem %s3264_s21, 1024 }
 0x2d1   : > { %1617 = vmatprep.mubr.f32.mxu0 %v512_v2  ;;  %p2214_p12 = scmp.ne.s32.totalorder %s3264_s21, %s2213_s17  ;;  %p2221_p2 = scmp.lt.s32.totalorder %s2219_s14, %s2213_s17 }
 0x2d2   : > { %v1519_v41 = vrot.slane %v1512_v7, %v2919_v43 }
 0x2d3   : > { %p2215_p13 = pnand %p2214_p12, %p2378_p4  ;;  %p2222_p3 = por %p2221_p2, %p2220_p1 }
 0x2d4   : > { %v1526_v15 = vrot.slane %v1519_v41, %v2919_v43  ;;  %1618 = vmatmul.mubr.f32.gmra.mrb[8].mxu0 %v511_v49  ;;  %v1644_v43 = vmul.f32 0.0, %v1640_v39 }
 0x2d5   : > { %p2216_p0 = pneg %p2215_p13 }
 0x2d6   : > { %v1528_v6 = vadd.f32 %v1526_v15, %v1435_v55 }
 0x2d7   : > { %p2223_p5 = pnand %p2222_p3, %p2216_p0 }
 0x2d8   : > { %1533 = vst.msk [vmem:[#allocation4] sm:$0x3] %vm2556_vm3, %v1528_v6 }
 0x2df   : > { %v1670_v9 = vld [vmem:[#allocation4] sm:$0x3] }
 0x2e0   : > { %2211 = vrcp.f32 %v1670_v9 }
 0x2ea   : > { %v2212_v50 = vpop.eup %2211 }
 0x2eb   : > { %v1684_v56 = vrot.slane %v2212_v50, %v2941_v0  ;;  %v1688_v31 = vrot.slane %v2212_v50, %v3461_v45 }
 0x39b   : > { %v1601_v44 = vpop.f32.mrb[2].mxu0 }
 0x39c   : > { %v1651_v22 = vadd.f32 %v1643_v37, %v1601_v44  ;;  %v1603_v1 = vpop.f32.mrb[3].mxu0 }
 0x39d   : > { %v1652_v27 = vadd.f32 %v1644_v43, %v1603_v1 }
 0x39e   : > { %v1691_v30 = vmul.f32 %v1684_v56, %v1651_v22 }
 0x39f   : > { %v1692_v34 = vmul.f32 %v1688_v31, %v1652_v27  ;;  %v1607_v47 = vpop.f32.mrb[4].mxu0 }
 0x3a0   : > { %v1701_v18 = vmul.f32 %v1700_v61, %v1691_v30  ;;  %v1653_v12 = vadd.f32 %v1643_v37, %v1607_v47  ;;  %v1609_v46 = vpop.f32.mrb[5].mxu0 }
 0x3a1   : > { %v1702_v28 = vmul.f32 %v1700_v61, %v1692_v34  ;;  %v1654_v33 = vadd.f32 %v1644_v43, %v1609_v46 }
 0x3a2   : > { %v1717_v0 = vadd.f32 %v1709_v63, %v1701_v18  ;;  %v1693_v10 = vmul.f32 %v1684_v56, %v1653_v12 }
 0x3a3   : > { %v1718_v29 = vadd.f32 %v1710_v57, %v1702_v28  ;;  %v1694_v13 = vmul.f32 %v1688_v31, %v1654_v33  ;;  %v1613_v58 = vpop.f32.mrb[6].mxu0 }
 0x3a4   : > { %1725 = vst [vmem:[%s3244_s19] sm:$0xff] %v1717_v0  ;;  %v1703_v17 = vmul.f32 %v1700_v61, %v1693_v10  ;;  %v1655_v20 = vadd.f32 %v1643_v37, %v1613_v58  ;;  %v1615_v25 = vpop.f32.mrb[7].mxu0 }
 0x3a5   : > { %1726 = vst [vmem:[%s3244_s19 + $0x8] sm:$0xff] %v1718_v29  ;;  %v1704_v42 = vmul.f32 %v1700_v61, %v1694_v13  ;;  %v1656_v5 = vadd.f32 %v1644_v43, %v1615_v25 }
 0x3a6   : > { %v1719_v51 = vadd.f32 %v1711_v59, %v1703_v17  ;;  %v1695_v23 = vmul.f32 %v1684_v56, %v1655_v20 }
 0x3a7   : > { %v1720_v3 = vadd.f32 %v1712_v60, %v1704_v42  ;;  %v1696_v53 = vmul.f32 %v1688_v31, %v1656_v5  ;;  %v1619_v24 = vpop.f32.mrb[8].mxu0 }
 0x3a8   : > { %1727 = vst [vmem:[%s3244_s19 + $0x10] sm:$0xff] %v1719_v51  ;;  %v1705_v19 = vmul.f32 %v1700_v61, %v1695_v23  ;;  %v1657_v52 = vadd.f32 %v1643_v37, %v1619_v24  ;;  %v1621_v36 = vpop.f32.mrb[9].mxu0 }
 0x3a9   : > { %1728 = vst [vmem:[%s3244_s19 + $0x18] sm:$0xff] %v1720_v3  ;;  %v1706_v54 = vmul.f32 %v1700_v61, %v1696_v53  ;;  %v1658_v32 = vadd.f32 %v1644_v43, %v1621_v36 }
 0x3aa   : > { %v1721_v14 = vadd.f32 %v1713_v21, %v1705_v19  ;;  %v1697_v11 = vmul.f32 %v1684_v56, %v1657_v52 }
 0x3ab   : > { %v1722_v16 = vadd.f32 %v1714_v8, %v1706_v54  ;;  %v1698_v38 = vmul.f32 %v1688_v31, %v1658_v32 }
 0x3ac   : > { %1729 = vst [vmem:[%s3244_s19 + $0x20] sm:$0xff] %v1721_v14  ;;  %v1707_v26 = vmul.f32 %v1700_v61, %v1697_v11 }
 0x3ad   : > { %1730 = vst [vmem:[%s3244_s19 + $0x28] sm:$0xff] %v1722_v16  ;;  %v1708_v2 = vmul.f32 %v1700_v61, %v1698_v38 }
 0x3ae   : > { %v1723_v7 = vadd.f32 %v1715_v48, %v1707_v26 }
 0x3af   : > { %v1724_v35 = vadd.f32 %v1716_v40, %v1708_v2 }
 0x3b0   : > { %1731 = vst [vmem:[%s3244_s19 + $0x30] sm:$0xff] %v1723_v7 }
 0x3b1   : > { %1732 = vst [vmem:[%s3244_s19 + $0x38] sm:$0xff] %v1724_v35 }
 0x3b2   : > { %2226 = shalt.err (!%p2223_p5)
}
 0x3b3   : > { %s2227_s15 = scalar_lea.hbm %s3262_s29, 1024  ;;  %s2231_s13 = scalar_lea.hbm %s3322_s6, 2048 }
 0x3b4   : > { %p2228_p6 = scmp.ne.s32.totalorder %s3262_s29, %s2227_s15  ;;  %p2232_p10 = scmp.lt.u32.totalorder %s3262_s29, %s3322_s6 }
 0x3b5   : > { %p2233_p11 = scmp.lt.u32.totalorder %s2231_s13, %s2227_s15  ;;  %p2235_p13 = scmp.lt.u32.totalorder %s2227_s15, %s3262_s29 }
 0x3b6   : > { %p2229_p7 = pnand %p2228_p6, %p2378_p4 }
 0x3b7   : > { %p2234_p12 = por %p2233_p11, %p2232_p10 }
 0x3b8   : > { %p2230_p9 = pneg %p2229_p7 }
 0x3b9   : > { %p2236_p0 = por %p2235_p13, %p2234_p12 }
 0x3bb   : > { %p2237_p1 = pnand %p2236_p0, %p2230_p9 }
 0x3bd   : > { %2240 = shalt.err (!%p2237_p1)
}
 0x3be   : > { %s2298_s20 = smov 256   ;;  %s2299_s22 = smov 16  }
 0x3bf   : > { %2017 = dma.vmem_to_hbm [thread:$0]  (%p2378_p4), %s3264_s21, 1024, %s3262_s29, %s3270_s26, %s2298_s20, %s2298_s20, %s2299_s22  }
 0x3c0 PF: > { %p2023_p2 = scmp.ge.s32.totalorder %s2291_s28, 2  ;;  %s1764_s5 = sand.u32 1, %s2271_s23  }
 0x3c1   : > { %s1765_s17 = scalar_lea.sflag [#allocation8], %s1764_s5 }
 0x3c2   : > { %p2020_p3 = pnand %p2023_p2, %p2385_p8 }
 0x3c4   : > { %2266 = dma.done.wait (!%p2020_p3), %s1765_s17, 1024  }
 0x3c5   : > { %2268 = vsyncadd (!%p2020_p3), %s1765_s17, 4294966272  ;;  %s20_s28 = sadd.s32 1, %s2291_s28   ;;  %s3462_s23 = smov %s2275_s24 }
 0x3c6   : > { %p17_p5 = scmp.ge.s32.totalorder %s20_s28, 4   ;;  %s3463_s24 = smov %s2279_s25 }
 0x3c7   : > { %s3464_s25 = smov %s2391_s11  ;;  %s3465_s26 = smov %s2287_s27 }
 0x3c8   : > { %s3466_s27 = smov %s3468_s30  ;;  %19 = sbr.rel (!%p17_p5) target bundleno = 6 (0x6), region = 96 }
 0x3cf   :  { %1770 = vsyncpa [#allocation8], 1 }
 0x3d0   :  { %1772 = vsyncpa [#allocation8 + $0x1], 1 }

</bundles_post_ra>
